<compile_context>
chip_gen: v5e
topology: v5e:2x2
jax: 0.10.0
libtpu: 0.0.40
codegen_flags: <defaults>
</compile_context>

<pallas_src>
import numpy as np

import jax
import jax.numpy as jnp
from jax import lax
from jax.experimental import pallas as pl
from jax.experimental.pallas import tpu as pltpu


def up_conv_bn_relu_kernel(x_ref, wt_ref, b_ref, o_ref):
    """One (batch, row-tile) per grid step.

    x_ref:  (1, TH+2, W+2, Cin)   original-resolution input tile, 1-px halo, NHWC
    wt_ref: (4*Cout, 9*Cin)       pre-summed phase weights (BN scale folded in)
    b_ref:  (4*Cout, 1)           folded conv+BN bias, per (phase, out-channel)
    o_ref:  (1, 4*Cout, TH*W)     phase-separated output, spatial flattened on lanes
    """
    TH = x_ref.shape[1] - 2
    W = x_ref.shape[2] - 2
    Cin = x_ref.shape[3]
    S = TH * W

    # im2col: the 9 spatial shifts side by side on the channel (lane) axis, built once.
    slabs = []
    for dr in range(3):
        for dc in range(3):
            slabs.append(x_ref[0, dr:dr + TH, dc:dc + W, :].reshape(S, Cin))
    patches = jnp.concatenate(slabs, axis=1)                 # (S, 9*Cin)

    # (4*Cout, 9*Cin) x (S, 9*Cin)^T -> (4*Cout, S): single MXU push with K=9*Cin,
    # result minor dim = large spatial axis -> lane-dense epilogue and stores.
    acc = lax.dot_general(
        wt_ref[...], patches,
        dimension_numbers=(((1,), (1,)), ((), ())),
        preferred_element_type=jnp.float32)

    y = jnp.maximum(acc + b_ref[...], 0.0)                   # folded bias + ReLU
    o_ref[0] = y.astype(o_ref.dtype)


def _pick_row_tile(H, W, Cin, Cout, itemsize, budget=8 * 2**20):
    """Largest divisor of H whose per-step VMEM intermediates stay within budget."""
    per_row = W * (9 * Cin * itemsize + 8 * Cout * 4) + (W + 2) * Cin * itemsize
    th = max(1, min(H, budget // max(per_row, 1)))
    while H % th:
        th -= 1
    return th


def up_layer_forward(x_nchw, conv_w, conv_b, bn_gamma, bn_beta,
                     bn_mean, bn_var, eps=1e-5):
    """x_nchw: (N, Cin, H, W) -> (N, Cout, 2H, 2W), matching up_layer.forward (eval BN)."""
    N, Cin, H, W = x_nchw.shape
    Cout = conv_w.shape[0]
    H2, W2 = 2 * H, 2 * W
    dtype = x_nchw.dtype
    itemsize = jnp.dtype(dtype).itemsize

    # ---- fold inference BatchNorm into conv weights / bias -------------------
    w_hwio = jnp.transpose(conv_w, (2, 3, 1, 0))             # (3,3,Cin,Cout)
    inv_std = lax.rsqrt(bn_var.astype(jnp.float32) + eps)
    scale = bn_gamma * inv_std                               # (Cout,)
    w_s = w_hwio * scale                                     # BN scale folded into W
    bias = (conv_b - bn_mean) * scale + bn_beta              # (Cout,)

    # ---- pre-sum 3x3 taps into per-phase effective kernels -------------------
    # For output (2r+pi, 2c+pj): 3x3 tap (kh,kw) on the upsampled grid hits padded
    # input position (r + 1 + (pi+kh-1)//2, c + 1 + (pj+kw-1)//2).
    sel = np.zeros((2, 2, 3, 3, 3, 3), np.float32)           # (pi,pj,kh,kw,dr,dc)
    for pi in range(2):
        for pj in range(2):
            for kh in range(3):
                for kw in range(3):
                    dr = 1 + (pi + kh - 1) // 2
                    dc = 1 + (pj + kw - 1) // 2
                    sel[pi, pj, kh, kw, dr, dc] = 1.0
    wbig = jnp.einsum("pqhwrd,hwio->rdipqo", sel, w_s)       # (3,3,Cin,2,2,Cout)
    wt = wbig.reshape(9 * Cin, 4 * Cout).T.astype(dtype)     # (4*Cout, 9*Cin)
    bias4 = jnp.tile(bias, 4).reshape(4 * Cout, 1).astype(jnp.float32)

    # ---- halo'd row tiles of the ORIGINAL-resolution input -------------------
    TH = _pick_row_tile(H, W, Cin, Cout, itemsize)
    nT = H // TH
    x_nhwc = jnp.transpose(x_nchw, (0, 2, 3, 1))             # (N,H,W,Cin)
    xpad = jnp.pad(x_nhwc, ((0, 0), (1, 1), (1, 1), (0, 0))) # (N,H+2,W+2,Cin)
    if nT == 1:
        x_tiles = xpad                                       # (N, H+2, W+2, Cin)
    else:
        rows = (jnp.arange(nT) * TH)[:, None] + jnp.arange(TH + 2)[None, :]
        x_tiles = xpad[:, rows].reshape(N * nT, TH + 2, W + 2, Cin)

    S = TH * W
    tile_bytes = ((TH + 2) * (W + 2) * Cin * itemsize        # input tile
                  + S * 9 * Cin * itemsize                   # im2col slab
                  + 4 * Cout * S * 4                         # f32 matmul result
                  + 4 * Cout * S * itemsize)                 # output tile
    vmem_limit = int(min(64 * 2**20, max(32 * 2**20, 4 * tile_bytes)))

    out = pl.pallas_call(
        up_conv_bn_relu_kernel,
        out_shape=jax.ShapeDtypeStruct((N * nT, 4 * Cout, S), dtype),
        grid_spec=pltpu.PrefetchScalarGridSpec(
            num_scalar_prefetch=0,
            grid=(N, nT),
            in_specs=[
                pl.BlockSpec((1, TH + 2, W + 2, Cin),
                             lambda n, t: (n * nT + t, 0, 0, 0)),
                pl.BlockSpec((4 * Cout, 9 * Cin), lambda n, t: (0, 0)),
                pl.BlockSpec((4 * Cout, 1), lambda n, t: (0, 0)),
            ],
            out_specs=pl.BlockSpec((1, 4 * Cout, S),
                                   lambda n, t: (n * nT + t, 0, 0)),
        ),
        compiler_params=pltpu.CompilerParams(
            dimension_semantics=("parallel", "parallel"),
            vmem_limit_bytes=vmem_limit,
        ),
    )(x_tiles, wt, bias4)

    # Phase-separated (N*nT, [pi,pj,co], r*W+c) -> NCHW (N, Cout, 2H, 2W).
    # Single cheap XLA interleave pass over the (non-inflated) output.
    out = out.reshape(N, nT, 2, 2, Cout, TH, W)
    out = jnp.transpose(out, (0, 4, 1, 5, 2, 6, 3))          # (N,Cout,nT,TH,pi,W,pj)
    return out.reshape(N, Cout, H2, W2)


def reference_forward(x_nchw, conv_w, conv_b, bn_gamma, bn_beta,
                      bn_mean, bn_var, eps=1e-5):
    """Pure-JAX reference (same semantics) for a correctness check."""
    x_up = jnp.repeat(jnp.repeat(x_nchw, 2, axis=2), 2, axis=3)
    x_nhwc = jnp.transpose(x_up, (0, 2, 3, 1))
    w_hwio = jnp.transpose(conv_w, (2, 3, 1, 0))
    y = lax.conv_general_dilated(
        x_nhwc, w_hwio, window_strides=(1, 1), padding="SAME",
        dimension_numbers=("NHWC", "HWIO", "NHWC"))
    y = y + conv_b.reshape(1, 1, 1, -1)
    y = (y - bn_mean) / jnp.sqrt(bn_var + eps) * bn_gamma + bn_beta
    y = jnp.maximum(y, 0.0)
    return jnp.transpose(y, (0, 3, 1, 2))


if __name__ == "__main__":
    # small shapes consistent with the module: N=2, Cin=4, H=W=16, Cout=8
    N, Cin, Cout, H, W = 2, 4, 8, 16, 16

    key = jax.random.PRNGKey(0)
    k_x, k_w, k_b, k_g, k_be, k_m, k_v = jax.random.split(key, 7)

    x = jax.random.normal(k_x, (N, Cin, H, W), jnp.float32)
    conv_w = jax.random.normal(k_w, (Cout, Cin, 3, 3), jnp.float32) * 0.1
    conv_b = jax.random.normal(k_b, (Cout,), jnp.float32) * 0.1
    bn_gamma = 1.0 + 0.1 * jax.random.normal(k_g, (Cout,), jnp.float32)
    bn_beta = 0.1 * jax.random.normal(k_be, (Cout,), jnp.float32)
    bn_mean = 0.1 * jax.random.normal(k_m, (Cout,), jnp.float32)
    bn_var = jnp.abs(jax.random.normal(k_v, (Cout,), jnp.float32)) + 0.5

    fwd = jax.jit(up_layer_forward)
    out = jax.block_until_ready(
        fwd(x, conv_w, conv_b, bn_gamma, bn_beta, bn_mean, bn_var))

    ref = reference_forward(x, conv_w, conv_b, bn_gamma, bn_beta, bn_mean, bn_var)
    assert out.shape == (N, Cout, 2 * H, 2 * W), out.shape
    assert jnp.allclose(out, ref, atol=1e-4, rtol=1e-4), float(
        jnp.max(jnp.abs(out - ref)))

    print("KERNEL_OK")
</pallas_src>

<mosaic_0001>
module attributes {stable_mosaic.version = 11 : i64} {
  func.func @up_conv_bn_relu_kernel(%arg0: i32, %arg1: i32, %arg2: memref<1x18x18x4xf32, #tpu.memory_space<vmem>>, %arg3: memref<32x36xf32, #tpu.memory_space<vmem>>, %arg4: memref<32x1xf32, #tpu.memory_space<vmem>>, %arg5: memref<1x32x256xf32, #tpu.memory_space<vmem>>) attributes {dimension_semantics = [#tpu.dimension_semantics<parallel>, #tpu.dimension_semantics<parallel>], iteration_bounds = array<i64: 2, 1>, scalar_prefetch = 0 : i64, scratch_operands = 0 : i64, tpu.core_type = #tpu.core_type<tc>, window_params = [{transform_indices = @transform_0, window_bounds = array<i64: 1, 18, 18, 4>}, {pipeline_mode = #tpu.pipeline_mode<synchronous>, transform_indices = @transform_1, window_bounds = array<i64: 32, 36>}, {pipeline_mode = #tpu.pipeline_mode<synchronous>, transform_indices = @transform_2, window_bounds = array<i64: 32, 1>}, {transform_indices = @transform_3, window_bounds = array<i64: 1, 32, 256>}]} {
    %c0 = arith.constant 0 : index
    %c0_0 = arith.constant 0 : index
    %c0_1 = arith.constant 0 : index
    %c0_2 = arith.constant 0 : index
    %0 = vector.load %arg2[%c0, %c0_0, %c0_1, %c0_2] : memref<1x18x18x4xf32, #tpu.memory_space<vmem>>, vector<1x16x16x4xf32>
    %1 = vector.shape_cast %0 : vector<1x16x16x4xf32> to vector<16x16x4xf32>
    %2 = vector.shape_cast %1 : vector<16x16x4xf32> to vector<256x4xf32>
    %c0_3 = arith.constant 0 : index
    %c0_4 = arith.constant 0 : index
    %c1 = arith.constant 1 : index
    %c0_5 = arith.constant 0 : index
    %3 = vector.load %arg2[%c0_3, %c0_4, %c1, %c0_5] : memref<1x18x18x4xf32, #tpu.memory_space<vmem>>, vector<1x16x16x4xf32>
    %4 = vector.shape_cast %3 : vector<1x16x16x4xf32> to vector<16x16x4xf32>
    %5 = vector.shape_cast %4 : vector<16x16x4xf32> to vector<256x4xf32>
    %c0_6 = arith.constant 0 : index
    %c0_7 = arith.constant 0 : index
    %c2 = arith.constant 2 : index
    %c0_8 = arith.constant 0 : index
    %6 = vector.load %arg2[%c0_6, %c0_7, %c2, %c0_8] : memref<1x18x18x4xf32, #tpu.memory_space<vmem>>, vector<1x16x16x4xf32>
    %7 = vector.shape_cast %6 : vector<1x16x16x4xf32> to vector<16x16x4xf32>
    %8 = vector.shape_cast %7 : vector<16x16x4xf32> to vector<256x4xf32>
    %c0_9 = arith.constant 0 : index
    %c1_10 = arith.constant 1 : index
    %c0_11 = arith.constant 0 : index
    %c0_12 = arith.constant 0 : index
    %9 = vector.load %arg2[%c0_9, %c1_10, %c0_11, %c0_12] : memref<1x18x18x4xf32, #tpu.memory_space<vmem>>, vector<1x16x16x4xf32>
    %10 = vector.shape_cast %9 : vector<1x16x16x4xf32> to vector<16x16x4xf32>
    %11 = vector.shape_cast %10 : vector<16x16x4xf32> to vector<256x4xf32>
    %c0_13 = arith.constant 0 : index
    %c1_14 = arith.constant 1 : index
    %c1_15 = arith.constant 1 : index
    %c0_16 = arith.constant 0 : index
    %12 = vector.load %arg2[%c0_13, %c1_14, %c1_15, %c0_16] : memref<1x18x18x4xf32, #tpu.memory_space<vmem>>, vector<1x16x16x4xf32>
    %13 = vector.shape_cast %12 : vector<1x16x16x4xf32> to vector<16x16x4xf32>
    %14 = vector.shape_cast %13 : vector<16x16x4xf32> to vector<256x4xf32>
    %c0_17 = arith.constant 0 : index
    %c1_18 = arith.constant 1 : index
    %c2_19 = arith.constant 2 : index
    %c0_20 = arith.constant 0 : index
    %15 = vector.load %arg2[%c0_17, %c1_18, %c2_19, %c0_20] : memref<1x18x18x4xf32, #tpu.memory_space<vmem>>, vector<1x16x16x4xf32>
    %16 = vector.shape_cast %15 : vector<1x16x16x4xf32> to vector<16x16x4xf32>
    %17 = vector.shape_cast %16 : vector<16x16x4xf32> to vector<256x4xf32>
    %c0_21 = arith.constant 0 : index
    %c2_22 = arith.constant 2 : index
    %c0_23 = arith.constant 0 : index
    %c0_24 = arith.constant 0 : index
    %18 = vector.load %arg2[%c0_21, %c2_22, %c0_23, %c0_24] : memref<1x18x18x4xf32, #tpu.memory_space<vmem>>, vector<1x16x16x4xf32>
    %19 = vector.shape_cast %18 : vector<1x16x16x4xf32> to vector<16x16x4xf32>
    %20 = vector.shape_cast %19 : vector<16x16x4xf32> to vector<256x4xf32>
    %c0_25 = arith.constant 0 : index
    %c2_26 = arith.constant 2 : index
    %c1_27 = arith.constant 1 : index
    %c0_28 = arith.constant 0 : index
    %21 = vector.load %arg2[%c0_25, %c2_26, %c1_27, %c0_28] : memref<1x18x18x4xf32, #tpu.memory_space<vmem>>, vector<1x16x16x4xf32>
    %22 = vector.shape_cast %21 : vector<1x16x16x4xf32> to vector<16x16x4xf32>
    %23 = vector.shape_cast %22 : vector<16x16x4xf32> to vector<256x4xf32>
    %c0_29 = arith.constant 0 : index
    %c2_30 = arith.constant 2 : index
    %c2_31 = arith.constant 2 : index
    %c0_32 = arith.constant 0 : index
    %24 = vector.load %arg2[%c0_29, %c2_30, %c2_31, %c0_32] : memref<1x18x18x4xf32, #tpu.memory_space<vmem>>, vector<1x16x16x4xf32>
    %25 = vector.shape_cast %24 : vector<1x16x16x4xf32> to vector<16x16x4xf32>
    %26 = vector.shape_cast %25 : vector<16x16x4xf32> to vector<256x4xf32>
    %27 = tpu.concatenate %2, %5, %8, %11, %14, %17, %20, %23, %26 in 1 : vector<256x4xf32>, vector<256x4xf32>, vector<256x4xf32>, vector<256x4xf32>, vector<256x4xf32>, vector<256x4xf32>, vector<256x4xf32>, vector<256x4xf32>, vector<256x4xf32> -> vector<256x36xf32>
    %c0_33 = arith.constant 0 : index
    %c0_34 = arith.constant 0 : index
    %28 = vector.load %arg3[%c0_33, %c0_34] : memref<32x36xf32, #tpu.memory_space<vmem>>, vector<32x36xf32>
    %cst = arith.constant dense<0.000000e+00> : vector<32x256xf32>
    %29 = tpu.matmul %28, %27, %cst {dimension_numbers = #tpu.dot_dimension_numbers<[1], [1], [0], [0], [0, 0, 1, 0], [], []>} : vector<32x36xf32>, vector<256x36xf32>, vector<32x256xf32> -> vector<32x256xf32>
    %c0_35 = arith.constant 0 : index
    %c0_36 = arith.constant 0 : index
    %30 = vector.load %arg4[%c0_35, %c0_36] : memref<32x1xf32, #tpu.memory_space<vmem>>, vector<32x1xf32>
    %31 = vector.broadcast %30 : vector<32x1xf32> to vector<32x256xf32>
    %32 = arith.addf %29, %31 : vector<32x256xf32>
    %cst_37 = arith.constant 0.000000e+00 : f32
    %33 = vector.broadcast %cst_37 : f32 to vector<32x256xf32>
    %34 = arith.maximumf %32, %33 : vector<32x256xf32>
    %c0_38 = arith.constant 0 : index
    %c0_39 = arith.constant 0 : index
    %c0_40 = arith.constant 0 : index
    %35 = vector.load %arg5[%c0_38, %c0_39, %c0_40] : memref<1x32x256xf32, #tpu.memory_space<vmem>>, vector<1x32x256xf32>
    %36 = vector.shape_cast %35 : vector<1x32x256xf32> to vector<32x256xf32>
    %37 = vector.shape_cast %34 : vector<32x256xf32> to vector<1x32x256xf32>
    tpu.vector_store %arg5[%c0_38, %c0_39, %c0_40], %37 {strides = array<i32>} : memref<1x32x256xf32, #tpu.memory_space<vmem>>, vector<1x32x256xf32>,
    return
  }
  func.func @transform_0(%arg0: i32, %arg1: i32) -> (i32, i32, i32, i32) {
    %c1_i32 = arith.constant 1 : i32
    %0 = arith.muli %arg0, %c1_i32 : i32
    %1 = arith.addi %0, %arg1 : i32
    %c0_i32 = arith.constant 0 : i32
    %c0_i32_0 = arith.constant 0 : i32
    %c0_i32_1 = arith.constant 0 : i32
    %c0_i32_2 = arith.constant 0 : i32
    return %1, %c0_i32, %c0_i32_0, %c0_i32_1 : i32, i32, i32, i32
  }
  func.func @transform_1(%arg0: i32, %arg1: i32) -> (i32, i32) {
    %c0_i32 = arith.constant 0 : i32
    %c0_i32_0 = arith.constant 0 : i32
    %c0_i32_1 = arith.constant 0 : i32
    return %c0_i32, %c0_i32_0 : i32, i32
  }
  func.func @transform_2(%arg0: i32, %arg1: i32) -> (i32, i32) {
    %c0_i32 = arith.constant 0 : i32
    %c0_i32_0 = arith.constant 0 : i32
    %c0_i32_1 = arith.constant 0 : i32
    return %c0_i32, %c0_i32_0 : i32, i32
  }
  func.func @transform_3(%arg0: i32, %arg1: i32) -> (i32, i32, i32) {
    %c1_i32 = arith.constant 1 : i32
    %0 = arith.muli %arg0, %c1_i32 : i32
    %1 = arith.addi %0, %arg1 : i32
    %c0_i32 = arith.constant 0 : i32
    %c0_i32_0 = arith.constant 0 : i32
    %c0_i32_1 = arith.constant 0 : i32
    return %1, %c0_i32, %c0_i32_0 : i32, i32, i32
  }
}

</mosaic_0001>

<bundles_post_ra>
// kernel: tile.8
= control target key start
LH: loop header
LB: loop body
LE: loop exit
PB: predicated region body
PF: predicated region fallthrough
CT: control target
= control target key end

     0   :  { %s22_s0 = inlined_call_operand.vmem [shape: f32[8], index: 0, kind: input, shape index: {}]   ;;  %s23_s1 = inlined_call_operand.vmem [shape: f32[4,8], index: 1, kind: output, shape index: {}]  }
   0x1   :  { %v4_v0 = vld [vmem:[%s22_s0] ss:$0 sm:$0xff] }
   0x2   :  { %5 = vst [vmem:[%s23_s1] sm:$0xf] %v4_v0 }

// kernel: tile.0
= control target key start
LH: loop header
LB: loop body
LE: loop exit
PB: predicated region body
PF: predicated region fallthrough
CT: control target
= control target key end

     0   :  { %s66_s8 = smov 125   ;;  %s67_s9 = smov 123   ;;  %vm7_vm0 = vcmask 7168   ;;  %s117_s0 = inlined_call_operand.vmem [shape: f32[4,8], index: 0, kind: input, shape index: {}]   ;;  %s118_s1 = inlined_call_operand.vmem [shape: f32[32,1], index: 1, kind: output, shape index: {}]  }
   0x1   :  { %v4_v0 = vld [vmem:[%s117_s0] sm:$0xf]  ;;  %s65_s0 = smov 127   ;;  %s68_s10 = smov 126  }
   0x2   :  { %5 = vst [vmem:[#allocation0] sm:$0xf] %v4_v0  ;;  %s69_s11 = smov 124   ;;  %s70_s12 = smov 122  }
   0x3   :  { %s71_s13 = smov 121  }
   0x9   :  { %v9_v1 = vld [vmem:[#allocation0] sm:$0xf]  }
   0xa   :  { %v21_v2 = vld [vmem:[#allocation0] sm:$0xf]   ;;  %10 = vrot.lane.b32.xlu0 %v9_v1, %s65_s0 }
   0xb   :  { %22 = vrot.lane.b32.xlu1 %v21_v2, %s66_s8  ;;  %v33_v3 = vld [vmem:[#allocation0] sm:$0xf]  }
   0xc   :  { %34 = vrot.lane.b32.xlu2 %v33_v3, %s67_s9  ;;  %v15_v4 = vld [vmem:[#allocation0] sm:$0xf]  }
   0xd   :  { %v27_v5 = vld [vmem:[#allocation0] sm:$0xf]  }
   0xe   :  { %v39_v6 = vld [vmem:[#allocation0] sm:$0xf]  }
   0xf   :  { %v45_v7 = vld [vmem:[#allocation0] sm:$0xf]  }
  0x10   :  { %v6_v8 = vld [vmem:[#allocation0] sm:$0xf]  }
  0x11   :  { %8 = vst.msk [vmem:[%s118_s1] ss:$8 sm:$0xf] %vm7_vm0, %v6_v8  }
  0x12   :  { %16 = vrot.lane.b32.xlu0 %v15_v4, %s68_s10 }
  0x13   :  { %28 = vrot.lane.b32.xlu1 %v27_v5, %s69_s11 }
  0x14   :  { %40 = vrot.lane.b32.xlu2 %v39_v6, %s70_s12 }
  0x1a   :  { %46 = vrot.lane.b32.xlu0 %v45_v7, %s71_s13 }
  0x66   :  { %v35_v9 = vpop.permute.xlu2 %34  }
  0x67   :  { %55 = vst.msk [vmem:[%s118_s1 + $0x5] ss:$8 sm:$0xf] %vm7_vm0, %v35_v9  }
  0x6e   :  { %v41_v10 = vpop.permute.xlu2 %40  }
  0x6f   :  { %56 = vst.msk [vmem:[%s118_s1 + $0x6] ss:$8 sm:$0xf] %vm7_vm0, %v41_v10  }
  0x7c   :  { %v11_v11 = vpop.permute.xlu0 %10  }
  0x7d   :  { %v23_v12 = vpop.permute.xlu1 %22   ;;  %51 = vst.msk [vmem:[%s118_s1 + $0x1] ss:$8 sm:$0xf] %vm7_vm0, %v11_v11  }
  0x7e   :  { %53 = vst.msk [vmem:[%s118_s1 + $0x3] ss:$8 sm:$0xf] %vm7_vm0, %v23_v12  }
  0x84   :  { %v17_v13 = vpop.permute.xlu0 %16  }
  0x85   :  { %v29_v14 = vpop.permute.xlu1 %28   ;;  %52 = vst.msk [vmem:[%s118_s1 + $0x2] ss:$8 sm:$0xf] %vm7_vm0, %v17_v13  }
  0x86   :  { %54 = vst.msk [vmem:[%s118_s1 + $0x4] ss:$8 sm:$0xf] %vm7_vm0, %v29_v14  }
  0x8c   :  { %v47_v15 = vpop.permute.xlu0 %46  }
  0x8d   :  { %57 = vst.msk [vmem:[%s118_s1 + $0x7] ss:$8 sm:$0xf] %vm7_vm0, %v47_v15  }

// kernel: up_layer_forward.1
= control target key start
LH: loop header
LB: loop body
LE: loop exit
PB: predicated region body
PF: predicated region fallthrough
CT: control target
= control target key end

     0   :  { %s2419_s12 = smov 0   ;;  %s2421_s13 = smov 0   ;;  %s4201_s0 = inlined_call_operand.vmem [shape: f32[2,18,18,4], index: 0, kind: input, shape index: {}]   ;;  %s4202_s1 = inlined_call_operand.vmem [shape: f32[32,36], index: 1, kind: input, shape index: {}]   ;;  %s4203_s2 = inlined_call_operand.vmem [shape: f32[32,1], index: 2, kind: input, shape index: {}]   ;;  %s4204_s3 = inlined_call_operand.vmem [shape: f32[2,32,256], index: 3, kind: output, shape index: {}]  }
   0x1   :  { %s2423_s14 = smov 0  }
   0x2 LB: > { %s25_s15 = sadd.s32 1, %s2384_s13  ;;  %p2055_p0 = scmp.ge.s32.totalorder %s2388_s14, 1  ;;  %s2388_s14 = sphi %s2423_s14, %s13_s14   ;;  %s2384_s13 = sphi %s2421_s13, %s4493_s13   ;;  %s2380_s12 = sphi %s2419_s12, %s4492_s12  }
   0x3   : > { %p27_p1 = scmp.ge.s32.totalorder %s25_s15, 2  ;;  %p155_p2 = scmp.lt.s32.totalorder %s2388_s14, 3 }
   0x5   : > { %s4495_s15 = smov (%p27_p1, %s25_s15), 0  ;;  %p156_p3 = pnand %p2055_p0, %p155_p2 }
   0x7   : > { %159 = sbr.rel (%p156_p3) target bundleno = 964 (0x3c4), region = 32 }
   0xc   : > { %p182_p4 = scmp.lt.s32.totalorder %s2380_s12, 1  ;;  %s2390_s20 = smov 4   ;;  %vm1509_vm0 = vcmask 31744   ;;  %vm1542_vm1 = vcmask 64512   ;;  %vm1575_vm2 = vcmask 97280   ;;  %vm1608_vm3 = vcmask 130048  }
   0xd   : > { %s2391_s21 = smov 8   ;;  %s2392_s22 = smov 12   ;;  %vm1641_vm4 = vcmask 162816   ;;  %vm1674_vm5 = vcmask 195584   ;;  %vm1707_vm6 = vcmask 228352   ;;  %vm1740_vm7 = vcmask 261120  }
   0xe   : > { %s4497_s12 = smov (!%p182_p4, %s2380_s12), 1  ;;  %s2393_s23 = smov 16   ;;  %vm1801_vm8 = vcmask 293888  }
   0xf   : > { %s2326_s16 = smul.u32 432, %s4497_s12  ;;  %s2394_s24 = smov 20  }
  0x10   : > { %s2395_s25 = smov 24   ;;  %s2396_s26 = smov 28  }
  0x11   : > { %s2443_s19 = scalar_lea.vmem %s4201_s0, %s2326_s16  ;;  %s2397_s27 = smov 32  }
  0x12   : > { %v2446_v0 = vld [vmem:[%s2443_s19 + $0x31] sm:$0xff]  ;;  %v2449_v1 = vld [vmem:[%s2443_s19 + $0x19] sm:$0xff]  ;;  %v227_v2 = vld [vmem:[%s2443_s19 + $0x1] sm:$0xff] }
  0x13   : > { %525 = vrot.lane.b32.xlu2 %v2446_v0, %s2390_s20  ;;  %521 = vrot.lane.b32.xlu1 %v2449_v1, %s2390_s20  ;;  %v2458_v3 = vld [vmem:[%s2443_s19 + $0x39] sm:$0xff]  ;;  %v2461_v4 = vld [vmem:[%s2443_s19 + $0x21] sm:$0xff] }
  0x14   : > { %517 = vrot.lane.b32.xlu0 %v227_v2, %s2390_s20  ;;  %v228_v5 = vld [vmem:[%s2443_s19 + $0x9] sm:$0xff]  ;;  %v2470_v6 = vld [vmem:[%s2443_s19 + $0x61] sm:$0xff]  ;;  %v2473_v7 = vld [vmem:[%s2443_s19 + $0x51] sm:$0xff] }
  0x15   : > { %v2476_v8 = vld [vmem:[%s2443_s19 + $0x49] sm:$0xff]  ;;  %v2485_v9 = vld [vmem:[%s2443_s19 + $0x81] sm:$0xff]  ;;  %v2488_v10 = vld [vmem:[%s2443_s19 + $0x79] sm:$0xff] }
  0x16   : > { %v2491_v11 = vld [vmem:[%s2443_s19 + $0x69] sm:$0xff]  ;;  %v2503_v13 = vld [vmem:[%s2443_s19 + $0x99] sm:$0xff]  ;;  %v2506_v14 = vld [vmem:[%s2443_s19 + $0x91] sm:$0xff] }
  0x17   : > { %v2500_v12 = vld [vmem:[%s2443_s19 + $0xa9] sm:$0xff]  ;;  %v2518_v16 = vld [vmem:[%s2443_s19 + $0xc1] sm:$0xff]  ;;  %v2521_v17 = vld [vmem:[%s2443_s19 + $0xb1] sm:$0xff] }
  0x18   : > { %v2515_v15 = vld [vmem:[%s2443_s19 + $0xc9] sm:$0xff]  ;;  %v2530_v18 = vld [vmem:[%s2443_s19 + $0xf1] sm:$0xff]  ;;  %v2533_v19 = vld [vmem:[%s2443_s19 + $0xe1] sm:$0xff] }
  0x19   : > { %v2536_v20 = vld [vmem:[%s2443_s19 + $0xd9] sm:$0xff]  ;;  %v2545_v21 = vld [vmem:[%s2443_s19 + $0x111] sm:$0xff]  ;;  %v2548_v22 = vld [vmem:[%s2443_s19 + $0x109] sm:$0xff] }
  0x1a   : > { %v2551_v23 = vld [vmem:[%s2443_s19 + $0xf9] sm:$0xff]  ;;  %v2563_v25 = vld [vmem:[%s2443_s19 + $0x129] sm:$0xff]  ;;  %v2566_v26 = vld [vmem:[%s2443_s19 + $0x121] sm:$0xff] }
  0x1b   : > { %527 = vrot.lane.b32.xlu2 %v2458_v3, %s2390_s20  ;;  %523 = vrot.lane.b32.xlu1 %v2461_v4, %s2390_s20  ;;  %v2560_v24 = vld [vmem:[%s2443_s19 + $0x139] sm:$0xff]  ;;  %v2578_v28 = vld [vmem:[%s2443_s19 + $0x151] sm:$0xff] }
  0x1c   : > { %519 = vrot.lane.b32.xlu0 %v228_v5, %s2390_s20  ;;  %v2575_v27 = vld [vmem:[%s2443_s19 + $0x159] sm:$0xff]  ;;  %v2581_v29 = vld [vmem:[%s2443_s19 + $0x141] sm:$0xff]  ;;  %v2591_v31 = vld [vmem:[%s2443_s19 + $0x171] sm:$0xff] }
  0x1d   : > { %v259_v30 = vld [vmem:[%s2443_s19 + $0x2] sm:$0xff]  ;;  %v2605_v34 = vld [vmem:[%s2443_s19 + $0x1a] sm:$0xff]  ;;  %v260_v35 = vld [vmem:[%s2443_s19 + $0xa] sm:$0xff] }
  0x1e   : > { %v2594_v32 = vld [vmem:[%s2443_s19 + $0x169] sm:$0xff]  ;;  %v2619_v38 = vld [vmem:[%s2443_s19 + $0x3a] sm:$0xff]  ;;  %v2622_v39 = vld [vmem:[%s2443_s19 + $0x32] sm:$0xff] }
  0x1f   : > { %v2602_v33 = vld [vmem:[%s2443_s19 + $0x22] sm:$0xff]  ;;  %v2616_v37 = vld [vmem:[%s2443_s19 + $0x4a] sm:$0xff]  ;;  %v2639_v43 = vld [vmem:[%s2443_s19 + $0x52] sm:$0xff] }
  0x20   : > { %v2633_v41 = vld [vmem:[%s2443_s19 + $0x6a] sm:$0xff]  ;;  %v2636_v42 = vld [vmem:[%s2443_s19 + $0x62] sm:$0xff]  ;;  %v2650_v45 = vld [vmem:[%s2443_s19 + $0x92] sm:$0xff] }
  0x21   : > { %v2653_v46 = vld [vmem:[%s2443_s19 + $0x82] sm:$0xff]  ;;  %v2656_v47 = vld [vmem:[%s2443_s19 + $0x7a] sm:$0xff]  ;;  %v2671_v51 = vld [vmem:[%s2443_s19 + $0xb2] sm:$0xff] }
  0x22   : > { %v2674_v52 = vld [vmem:[%s2443_s19 + $0xaa] sm:$0xff]  ;;  %v2677_v53 = vld [vmem:[%s2443_s19 + $0x9a] sm:$0xff]  ;;  %v2698_v59 = vld [vmem:[%s2443_s19 + $0xc2] sm:$0xff] }
  0x23   : > { %533 = vrot.lane.b32.xlu2 %v2470_v6, %s2390_s20  ;;  %531 = vrot.lane.b32.xlu1 %v2473_v7, %s2390_s20  ;;  %v2692_v57 = vld [vmem:[%s2443_s19 + $0xda] sm:$0xff]  ;;  %v2695_v58 = vld [vmem:[%s2443_s19 + $0xca] sm:$0xff] }
  0x24   : > { %529 = vrot.lane.b32.xlu0 %v2476_v8, %s2390_s20  ;;  %v2713_v63 = vld [vmem:[%s2443_s19 + $0xfa] sm:$0xff]  ;;  %v2716_v2 = vld [vmem:[%s2443_s19 + $0xf2] sm:$0xff]  ;;  %v2719_v5 = vld [vmem:[%s2443_s19 + $0xe2] sm:$0xff] }
  0x2b   : > { %539 = vrot.lane.b32.xlu2 %v2485_v9, %s2390_s20  ;;  %537 = vrot.lane.b32.xlu1 %v2488_v10, %s2390_s20 }
  0x2c   : > { %535 = vrot.lane.b32.xlu0 %v2491_v11, %s2390_s20 }
  0x33   : > { %545 = vrot.lane.b32.xlu2 %v2500_v12, %s2390_s20  ;;  %543 = vrot.lane.b32.xlu1 %v2503_v13, %s2390_s20 }
  0x34   : > { %541 = vrot.lane.b32.xlu0 %v2506_v14, %s2390_s20 }
  0x3b   : > { %551 = vrot.lane.b32.xlu2 %v2515_v15, %s2390_s20  ;;  %549 = vrot.lane.b32.xlu1 %v2518_v16, %s2390_s20 }
  0x3c   : > { %547 = vrot.lane.b32.xlu0 %v2521_v17, %s2390_s20 }
  0x43   : > { %557 = vrot.lane.b32.xlu2 %v2530_v18, %s2390_s20  ;;  %555 = vrot.lane.b32.xlu1 %v2533_v19, %s2390_s20 }
  0x44   : > { %553 = vrot.lane.b32.xlu0 %v2536_v20, %s2390_s20 }
  0x4b   : > { %563 = vrot.lane.b32.xlu2 %v2545_v21, %s2390_s20  ;;  %561 = vrot.lane.b32.xlu1 %v2548_v22, %s2390_s20 }
  0x4c   : > { %559 = vrot.lane.b32.xlu0 %v2551_v23, %s2390_s20 }
  0x53   : > { %569 = vrot.lane.b32.xlu2 %v2560_v24, %s2390_s20  ;;  %567 = vrot.lane.b32.xlu1 %v2563_v25, %s2390_s20 }
  0x54   : > { %565 = vrot.lane.b32.xlu0 %v2566_v26, %s2390_s20 }
  0x5b   : > { %575 = vrot.lane.b32.xlu2 %v2575_v27, %s2390_s20  ;;  %573 = vrot.lane.b32.xlu1 %v2578_v28, %s2390_s20 }
  0x5c   : > { %571 = vrot.lane.b32.xlu0 %v2581_v29, %s2390_s20 }
  0x63   : > { %645 = vrot.lane.b32.xlu2 %v259_v30, %s2391_s21  ;;  %579 = vrot.lane.b32.xlu1 %v2591_v31, %s2390_s20 }
  0x64   : > { %577 = vrot.lane.b32.xlu0 %v2594_v32, %s2390_s20 }
  0x6b   : > { %651 = vrot.lane.b32.xlu2 %v2602_v33, %s2391_s21  ;;  %649 = vrot.lane.b32.xlu1 %v2605_v34, %s2391_s21 }
  0x6c   : > { %647 = vrot.lane.b32.xlu0 %v260_v35, %s2391_s21 }
  0x6d   : > { %v2613_v36 = vpop.permute.xlu2 %525 }
  0x6e   : > { %4251 = vst [vmem:[#allocation2_spill] sm:$0xff] %v2613_v36  ;;  %v2761_v36 = vld [vmem:[%s2443_s19 + $0x12a] sm:$0xff] }
  0x73   : > { %657 = vrot.lane.b32.xlu2 %v2616_v37, %s2391_s21  ;;  %655 = vrot.lane.b32.xlu1 %v2619_v38, %s2391_s21 }
  0x74   : > { %653 = vrot.lane.b32.xlu0 %v2622_v39, %s2391_s21 }
  0x75   : > { %v2630_v40 = vpop.permute.xlu2 %527 }
  0x76   : > { %4252 = vst [vmem:[#allocation3_spill] sm:$0xff] %v2630_v40  ;;  %v2740_v40 = vld [vmem:[%s2443_s19 + $0x10a] sm:$0xff] }
  0x7b   : > { %663 = vrot.lane.b32.xlu2 %v2633_v41, %s2391_s21  ;;  %661 = vrot.lane.b32.xlu1 %v2636_v42, %s2391_s21 }
  0x7c   : > { %659 = vrot.lane.b32.xlu0 %v2639_v43, %s2391_s21 }
  0x7d   : > { %v2647_v44 = vpop.permute.xlu2 %533 }
  0x7e   : > { %4253 = vst [vmem:[#allocation4_spill] sm:$0xff] %v2647_v44  ;;  %v2737_v44 = vld [vmem:[%s2443_s19 + $0x112] sm:$0xff] }
  0x83   : > { %669 = vrot.lane.b32.xlu2 %v2650_v45, %s2391_s21  ;;  %667 = vrot.lane.b32.xlu1 %v2653_v46, %s2391_s21 }
  0x84   : > { %665 = vrot.lane.b32.xlu0 %v2656_v47, %s2391_s21 }
  0x85   : > { %v2664_v48 = vpop.permute.xlu2 %539  ;;  %v2666_v49 = vpop.permute.xlu1 %521 }
  0x86   : > { %4254 = vst [vmem:[#allocation5_spill] sm:$0xff] %v2664_v48  ;;  %v2668_v50 = vpop.permute.xlu0 %517  ;;  %v2734_v48 = vld [vmem:[%s2443_s19 + $0x122] sm:$0xff] }
  0x87   : > { %4255 = vst [vmem:[#allocation6_spill] sm:$0xff] %v2666_v49  ;;  %v2797_v49 = vld [vmem:[%s2443_s19 + $0x172] sm:$0xff] }
  0x88   : > { %4256 = vst [vmem:[#allocation7_spill] sm:$0xff] %v2668_v50  ;;  %v2755_v50 = vld [vmem:[%s2443_s19 + $0x142] sm:$0xff] }
  0x89   : > { %4269 = vst [vmem:[#allocation20_spill] sm:$0xff] %v2755_v50 }
  0x8a   : > { %4279 = vst [vmem:[#allocation30_spill] sm:$0xff] %v2797_v49 }
  0x8b   : > { %675 = vrot.lane.b32.xlu2 %v2671_v51, %s2391_s21  ;;  %673 = vrot.lane.b32.xlu1 %v2674_v52, %s2391_s21 }
  0x8c   : > { %671 = vrot.lane.b32.xlu0 %v2677_v53, %s2391_s21 }
  0x8d   : > { %v2685_v54 = vpop.permute.xlu2 %545  ;;  %v2687_v55 = vpop.permute.xlu1 %523 }
  0x8e   : > { %4257 = vst [vmem:[#allocation8_spill] sm:$0xff] %v2685_v54  ;;  %v2689_v56 = vpop.permute.xlu0 %519 }
  0x8f   : > { %4258 = vst [vmem:[#allocation9_spill] sm:$0xff] %v2687_v55  ;;  %v2800_v55 = vld [vmem:[%s2443_s19 + $0x18] sm:$0xff] }
  0x90   : > { %4259 = vst [vmem:[#allocation10_spill] sm:$0xff] %v2689_v56  ;;  %v2776_v56 = vld [vmem:[%s2443_s19 + $0x16a] sm:$0xff] }
  0x91   : > { %4273 = vst [vmem:[#allocation24_spill] sm:$0xff] %v2776_v56 }
  0x92   : > { %4280 = vst [vmem:[#allocation31_spill] sm:$0xff] %v2800_v55 }
  0x93   : > { %681 = vrot.lane.b32.xlu2 %v2692_v57, %s2391_s21  ;;  %679 = vrot.lane.b32.xlu1 %v2695_v58, %s2391_s21 }
  0x94   : > { %677 = vrot.lane.b32.xlu0 %v2698_v59, %s2391_s21 }
  0x95   : > { %v2706_v60 = vpop.permute.xlu2 %551  ;;  %v2708_v61 = vpop.permute.xlu1 %531 }
  0x96   : > { %4260 = vst [vmem:[#allocation11_spill] sm:$0xff] %v2706_v60  ;;  %v2710_v62 = vpop.permute.xlu0 %529  ;;  %v2782_v60 = vld [vmem:[%s2443_s19 + $0x152] sm:$0xff] }
  0x97   : > { %4261 = vst [vmem:[#allocation12_spill] sm:$0xff] %v2708_v61  ;;  %v2758_v61 = vld [vmem:[%s2443_s19 + $0x13a] sm:$0xff] }
  0x98   : > { %4262 = vst [vmem:[#allocation13_spill] sm:$0xff] %v2710_v62 }
  0x99   : > { %4275 = vst [vmem:[#allocation26_spill] sm:$0xff] %v2782_v60 }
  0x9b   : > { %687 = vrot.lane.b32.xlu2 %v2713_v63, %s2391_s21  ;;  %685 = vrot.lane.b32.xlu1 %v2716_v2, %s2391_s21 }
  0x9c   : > { %683 = vrot.lane.b32.xlu0 %v2719_v5, %s2391_s21 }
  0x9d   : > { %v2727_v30 = vpop.permute.xlu2 %557  ;;  %v2729_v35 = vpop.permute.xlu1 %537 }
  0x9e   : > { %4263 = vst [vmem:[#allocation14_spill] sm:$0xff] %v2727_v30  ;;  %v2731_v54 = vpop.permute.xlu0 %535  ;;  %v2779_v30 = vld [vmem:[%s2443_s19 + $0x15a] sm:$0xff] }
  0x9f   : > { %4264 = vst [vmem:[#allocation15_spill] sm:$0xff] %v2729_v35 }
  0xa0   : > { %4265 = vst [vmem:[#allocation16_spill] sm:$0xff] %v2731_v54 }
  0xa1   : > { %4274 = vst [vmem:[#allocation25_spill] sm:$0xff] %v2779_v30 }
  0xa3   : > { %693 = vrot.lane.b32.xlu2 %v2734_v48, %s2391_s21  ;;  %691 = vrot.lane.b32.xlu1 %v2737_v44, %s2391_s21 }
  0xa4   : > { %689 = vrot.lane.b32.xlu0 %v2740_v40, %s2391_s21 }
  0xa5   : > { %v2748_v62 = vpop.permute.xlu2 %563  ;;  %v2750_v54 = vpop.permute.xlu1 %543 }
  0xa6   : > { %4266 = vst [vmem:[#allocation17_spill] sm:$0xff] %v2748_v62  ;;  %v2752_v35 = vpop.permute.xlu0 %541 }
  0xa7   : > { %4267 = vst [vmem:[#allocation18_spill] sm:$0xff] %v2750_v54 }
  0xa8   : > { %4268 = vst [vmem:[#allocation19_spill] sm:$0xff] %v2752_v35 }
  0xab   : > { %699 = vrot.lane.b32.xlu2 %v2755_v50, %s2391_s21  ;;  %697 = vrot.lane.b32.xlu1 %v2758_v61, %s2391_s21  ;;  %v2818_v50 = vld [vmem:[%s2443_s19 + $0x38] sm:$0xff] }
  0xac   : > { %695 = vrot.lane.b32.xlu0 %v2761_v36, %s2391_s21  ;;  %4285 = vst [vmem:[#allocation36_spill] sm:$0xff] %v2818_v50 }
  0xad   : > { %v2769_v54 = vpop.permute.xlu2 %569  ;;  %v2771_v35 = vpop.permute.xlu1 %549 }
  0xae   : > { %4270 = vst [vmem:[#allocation21_spill] sm:$0xff] %v2769_v54  ;;  %v2773_v62 = vpop.permute.xlu0 %547 }
  0xaf   : > { %4271 = vst [vmem:[#allocation22_spill] sm:$0xff] %v2771_v35 }
  0xb0   : > { %4272 = vst [vmem:[#allocation23_spill] sm:$0xff] %v2773_v62 }
  0xb3   : > { %705 = vrot.lane.b32.xlu2 %v2776_v56, %s2391_s21  ;;  %703 = vrot.lane.b32.xlu1 %v2779_v30, %s2391_s21  ;;  %v2803_v56 = vld [vmem:[%s2443_s19 + $0x20] sm:$0xff]  ;;  %v2824_v30 = vld [vmem:[%s2443_s19 + $0x30] sm:$0xff] }
  0xb4   : > { %701 = vrot.lane.b32.xlu0 %v2782_v60, %s2391_s21  ;;  %4281 = vst [vmem:[#allocation32_spill] sm:$0xff] %v2803_v56  ;;  %v2821_v60 = vld [vmem:[%s2443_s19 + $0x48] sm:$0xff] }
  0xb5   : > { %v2790_v35 = vpop.permute.xlu2 %575  ;;  %v2792_v62 = vpop.permute.xlu1 %555  ;;  %4286 = vst [vmem:[#allocation37_spill] sm:$0xff] %v2821_v60 }
  0xb6   : > { %4276 = vst [vmem:[#allocation27_spill] sm:$0xff] %v2790_v35  ;;  %v2794_v54 = vpop.permute.xlu0 %553 }
  0xb7   : > { %4277 = vst [vmem:[#allocation28_spill] sm:$0xff] %v2792_v62 }
  0xb8   : > { %4278 = vst [vmem:[#allocation29_spill] sm:$0xff] %v2794_v54 }
  0xb9   : > { %4287 = vst [vmem:[#allocation38_spill] sm:$0xff] %v2824_v30 }
  0xbb   : > { %775 = vrot.lane.b32.xlu2 %v2803_v56, %s2392_s22  ;;  %773 = vrot.lane.b32.xlu1 %v2800_v55, %s2392_s22  ;;  %v2839_v55 = vld [vmem:[%s2443_s19 + $0x60] sm:$0xff]  ;;  %v2842_v56 = vld [vmem:[%s2443_s19 + $0x68] sm:$0xff] }
  0xbc   : > { %707 = vrot.lane.b32.xlu0 %v2797_v49, %s2391_s21  ;;  %4291 = vst [vmem:[#allocation42_spill] sm:$0xff] %v2839_v55  ;;  %v2845_v49 = vld [vmem:[%s2443_s19 + $0x50] sm:$0xff]  ;;  %s2293_s21 = sshll.u32 %s4497_s12, 6 }
  0xbd   : > { %v2811_v35 = vpop.permute.xlu2 %645  ;;  %v2813_v62 = vpop.permute.xlu1 %561  ;;  %4292 = vst [vmem:[#allocation43_spill] sm:$0xff] %v2842_v56 }
  0xbe   : > { %4282 = vst [vmem:[#allocation33_spill] sm:$0xff] %v2811_v35  ;;  %v2815_v54 = vpop.permute.xlu0 %559 }
  0xbf   : > { %4283 = vst [vmem:[#allocation34_spill] sm:$0xff] %v2813_v62 }
  0xc0   : > { %4284 = vst [vmem:[#allocation35_spill] sm:$0xff] %v2815_v54 }
  0xc1   : > { %4293 = vst [vmem:[#allocation44_spill] sm:$0xff] %v2845_v49 }
  0xc3   : > { %781 = vrot.lane.b32.xlu2 %v2821_v60, %s2392_s22  ;;  %779 = vrot.lane.b32.xlu1 %v2818_v50, %s2392_s22  ;;  %v2860_v60 = vld [vmem:[%s2443_s19 + $0x80] sm:$0xff] }
  0xc4   : > { %777 = vrot.lane.b32.xlu0 %v2824_v30, %s2392_s22  ;;  %4297 = vst [vmem:[#allocation48_spill] sm:$0xff] %v2860_v60 }
  0xc5   : > { %v2832_v35 = vpop.permute.xlu2 %651  ;;  %v2834_v62 = vpop.permute.xlu1 %567 }
  0xc6   : > { %4288 = vst [vmem:[#allocation39_spill] sm:$0xff] %v2832_v35  ;;  %v2836_v54 = vpop.permute.xlu0 %565  ;;  %v2866_v35 = vld [vmem:[%s2443_s19 + $0x78] sm:$0xff] }
  0xc7   : > { %4289 = vst [vmem:[#allocation40_spill] sm:$0xff] %v2834_v62  ;;  %v2863_v62 = vld [vmem:[%s2443_s19 + $0x90] sm:$0xff] }
  0xc8   : > { %4290 = vst [vmem:[#allocation41_spill] sm:$0xff] %v2836_v54 }
  0xc9   : > { %4298 = vst [vmem:[#allocation49_spill] sm:$0xff] %v2863_v62 }
  0xca   : > { %4299 = vst [vmem:[#allocation50_spill] sm:$0xff] %v2866_v35 }
  0xcb   : > { %787 = vrot.lane.b32.xlu2 %v2842_v56, %s2392_s22  ;;  %785 = vrot.lane.b32.xlu1 %v2839_v55, %s2392_s22 }
  0xcc   : > { %783 = vrot.lane.b32.xlu0 %v2845_v49, %s2392_s22  ;;  %v2885_v49 = vld [vmem:[%s2443_s19 + $0x98] sm:$0xff] }
  0xcd   : > { %v2853_v50 = vpop.permute.xlu2 %657  ;;  %v2855_v30 = vpop.permute.xlu1 %573  ;;  %4304 = vst [vmem:[#allocation55_spill] sm:$0xff] %v2885_v49 }
  0xce   : > { %4294 = vst [vmem:[#allocation45_spill] sm:$0xff] %v2853_v50  ;;  %v2857_v54 = vpop.permute.xlu0 %571 }
  0xcf   : > { %4295 = vst [vmem:[#allocation46_spill] sm:$0xff] %v2855_v30  ;;  %v2882_v30 = vld [vmem:[%s2443_s19 + $0xb0] sm:$0xff] }
  0xd0   : > { %4296 = vst [vmem:[#allocation47_spill] sm:$0xff] %v2857_v54  ;;  %v209_v54 = vld [vmem:[%s2443_s19 + $0xa8] sm:$0xff] }
  0xd1   : > { %4303 = vst [vmem:[#allocation54_spill] sm:$0xff] %v2882_v30 }
  0xd3   : > { %793 = vrot.lane.b32.xlu2 %v2863_v62, %s2392_s22  ;;  %791 = vrot.lane.b32.xlu1 %v2860_v60, %s2392_s22 }
  0xd4   : > { %789 = vrot.lane.b32.xlu0 %v2866_v35, %s2392_s22  ;;  %v2905_v35 = vld [vmem:[%s2443_s19 + $0xc0] sm:$0xff] }
  0xd5   : > { %v2874_v55 = vpop.permute.xlu2 %663  ;;  %v2876_v50 = vpop.permute.xlu1 %579  ;;  %4310 = vst [vmem:[#allocation61_spill] sm:$0xff] %v2905_v35 }
  0xd6   : > { %4300 = vst [vmem:[#allocation51_spill] sm:$0xff] %v2874_v55  ;;  %v2878_v56 = vpop.permute.xlu0 %577 }
  0xd7   : > { %4301 = vst [vmem:[#allocation52_spill] sm:$0xff] %v2876_v50  ;;  %v2902_v50 = vld [vmem:[%s2443_s19 + $0xd8] sm:$0xff] }
  0xd8   : > { %4302 = vst [vmem:[#allocation53_spill] sm:$0xff] %v2878_v56  ;;  %v2899_v56 = vld [vmem:[%s2443_s19 + $0xc8] sm:$0xff] }
  0xd9   : > { %4308 = vst [vmem:[#allocation59_spill] sm:$0xff] %v2899_v56 }
  0xda   : > { %4309 = vst [vmem:[#allocation60_spill] sm:$0xff] %v2902_v50 }
  0xdb   : > { %799 = vrot.lane.b32.xlu2 %v2882_v30, %s2392_s22  ;;  %797 = vrot.lane.b32.xlu1 %v209_v54, %s2392_s22  ;;  %v2920_v30 = vld [vmem:[%s2443_s19 + $0xf0] sm:$0xff] }
  0xdc   : > { %795 = vrot.lane.b32.xlu0 %v2885_v49, %s2392_s22  ;;  %4314 = vst [vmem:[#allocation65_spill] sm:$0xff] %v2920_v30  ;;  %v2926_v49 = vld [vmem:[%s2443_s19 + $0xe0] sm:$0xff] }
  0xdd   : > { %v2892_v60 = vpop.permute.xlu2 %669  ;;  %v2894_v55 = vpop.permute.xlu1 %649  ;;  %4316 = vst [vmem:[#allocation67_spill] sm:$0xff] %v2926_v49 }
  0xde   : > { %4305 = vst [vmem:[#allocation56_spill] sm:$0xff] %v2892_v60  ;;  %v2896_v62 = vpop.permute.xlu0 %647 }
  0xdf   : > { %4306 = vst [vmem:[#allocation57_spill] sm:$0xff] %v2894_v55  ;;  %v2923_v55 = vld [vmem:[%s2443_s19 + $0xf8] sm:$0xff] }
  0xe0   : > { %4307 = vst [vmem:[#allocation58_spill] sm:$0xff] %v2896_v62 }
  0xe1   : > { %4315 = vst [vmem:[#allocation66_spill] sm:$0xff] %v2923_v55 }
  0xe3   : > { %805 = vrot.lane.b32.xlu2 %v2902_v50, %s2392_s22  ;;  %803 = vrot.lane.b32.xlu1 %v2899_v56, %s2392_s22  ;;  %v2941_v56 = vld [vmem:[%s2443_s19 + $0x110] sm:$0xff]  ;;  %v2944_v50 = vld [vmem:[%s2443_s19 + $0x120] sm:$0xff] }
  0xe4   : > { %801 = vrot.lane.b32.xlu0 %v2905_v35, %s2392_s22  ;;  %4320 = vst [vmem:[#allocation71_spill] sm:$0xff] %v2941_v56  ;;  %v2947_v35 = vld [vmem:[%s2443_s19 + $0x108] sm:$0xff] }
  0xe5   : > { %v2913_v54 = vpop.permute.xlu2 %675  ;;  %v2915_v60 = vpop.permute.xlu1 %655  ;;  %4321 = vst [vmem:[#allocation72_spill] sm:$0xff] %v2944_v50 }
  0xe6   : > { %4311 = vst [vmem:[#allocation62_spill] sm:$0xff] %v2913_v54  ;;  %v2917_v62 = vpop.permute.xlu0 %653 }
  0xe7   : > { %4312 = vst [vmem:[#allocation63_spill] sm:$0xff] %v2915_v60 }
  0xe8   : > { %4313 = vst [vmem:[#allocation64_spill] sm:$0xff] %v2917_v62 }
  0xe9   : > { %4322 = vst [vmem:[#allocation73_spill] sm:$0xff] %v2947_v35 }
  0xeb   : > { %811 = vrot.lane.b32.xlu2 %v2923_v55, %s2392_s22  ;;  %809 = vrot.lane.b32.xlu1 %v2920_v30, %s2392_s22  ;;  %v2962_v55 = vld [vmem:[%s2443_s19 + $0x138] sm:$0xff] }
  0xec   : > { %807 = vrot.lane.b32.xlu0 %v2926_v49, %s2392_s22  ;;  %4326 = vst [vmem:[#allocation77_spill] sm:$0xff] %v2962_v55  ;;  %v2968_v49 = vld [vmem:[%s2443_s19 + $0x128] sm:$0xff] }
  0xed   : > { %v2934_v54 = vpop.permute.xlu2 %681  ;;  %v2936_v60 = vpop.permute.xlu1 %661  ;;  %4328 = vst [vmem:[#allocation79_spill] sm:$0xff] %v2968_v49 }
  0xee   : > { %4317 = vst [vmem:[#allocation68_spill] sm:$0xff] %v2934_v54  ;;  %v2938_v62 = vpop.permute.xlu0 %659  ;;  %v2965_v54 = vld [vmem:[%s2443_s19 + $0x140] sm:$0xff] }
  0xef   : > { %4318 = vst [vmem:[#allocation69_spill] sm:$0xff] %v2936_v60 }
  0xf0   : > { %4319 = vst [vmem:[#allocation70_spill] sm:$0xff] %v2938_v62 }
  0xf1   : > { %4327 = vst [vmem:[#allocation78_spill] sm:$0xff] %v2965_v54 }
  0xf3   : > { %817 = vrot.lane.b32.xlu2 %v2944_v50, %s2392_s22  ;;  %815 = vrot.lane.b32.xlu1 %v2941_v56, %s2392_s22  ;;  %v2989_v56 = vld [vmem:[%s2443_s19 + $0x150] sm:$0xff] }
  0xf4   : > { %813 = vrot.lane.b32.xlu0 %v2947_v35, %s2392_s22  ;;  %v2986_v35 = vld [vmem:[%s2443_s19 + $0x168] sm:$0xff] }
  0xf5   : > { %v2955_v60 = vpop.permute.xlu2 %687  ;;  %v2957_v62 = vpop.permute.xlu1 %667  ;;  %4333 = vst [vmem:[#allocation84_spill] sm:$0xff] %v2986_v35 }
  0xf6   : > { %4323 = vst [vmem:[#allocation74_spill] sm:$0xff] %v2955_v60  ;;  %v2959_v30 = vpop.permute.xlu0 %665  ;;  %v2983_v60 = vld [vmem:[%s2443_s19 + $0x158] sm:$0xff] }
  0xf7   : > { %4324 = vst [vmem:[#allocation75_spill] sm:$0xff] %v2957_v62 }
  0xf8   : > { %4325 = vst [vmem:[#allocation76_spill] sm:$0xff] %v2959_v30 }
  0xf9   : > { %4332 = vst [vmem:[#allocation83_spill] sm:$0xff] %v2983_v60 }
  0xfb   : > { %823 = vrot.lane.b32.xlu2 %v2965_v54, %s2392_s22  ;;  %821 = vrot.lane.b32.xlu1 %v2962_v55, %s2392_s22  ;;  %v3007_v54 = vld [vmem:[%s2443_s19 + $0x180] sm:$0xff] }
  0xfc   : > { %819 = vrot.lane.b32.xlu0 %v2968_v49, %s2392_s22  ;;  %4337 = vst [vmem:[#allocation88_spill] sm:$0xff] %v3007_v54  ;;  %v3010_v49 = vld [vmem:[%s2443_s19 + $0x170] sm:$0xff] }
  0xfd   : > { %v2976_v62 = vpop.permute.xlu2 %693  ;;  %v2978_v30 = vpop.permute.xlu1 %673 }
  0xfe   : > { %4329 = vst [vmem:[#allocation80_spill] sm:$0xff] %v2976_v62  ;;  %v2980_v50 = vpop.permute.xlu0 %671  ;;  %v3004_v62 = vld [vmem:[%s2443_s19 + $0x188] sm:$0xff] }
  0xff   : > { %4330 = vst [vmem:[#allocation81_spill] sm:$0xff] %v2978_v30 }
 0x100   : > { %4331 = vst [vmem:[#allocation82_spill] sm:$0xff] %v2980_v50 }
 0x101   : > { %4336 = vst [vmem:[#allocation87_spill] sm:$0xff] %v3004_v62 }
 0x103   : > { %829 = vrot.lane.b32.xlu2 %v2986_v35, %s2392_s22  ;;  %827 = vrot.lane.b32.xlu1 %v2983_v60, %s2392_s22 }
 0x104   : > { %825 = vrot.lane.b32.xlu0 %v2989_v56, %s2392_s22 }
 0x105   : > { %v2997_v55 = vpop.permute.xlu2 %699  ;;  %v2999_v30 = vpop.permute.xlu1 %679 }
 0x106   : > { %4334 = vst [vmem:[#allocation85_spill] sm:$0xff] %v2999_v30  ;;  %v3001_v50 = vpop.permute.xlu0 %677 }
 0x107   : > { %4335 = vst [vmem:[#allocation86_spill] sm:$0xff] %v3001_v50 }
 0x10b   : > { %835 = vrot.lane.b32.xlu2 %v3004_v62, %s2392_s22  ;;  %833 = vrot.lane.b32.xlu1 %v3007_v54, %s2392_s22 }
 0x10c   : > { %831 = vrot.lane.b32.xlu0 %v3010_v49, %s2392_s22 }
 0x10d   : > { %v3018_v60 = vpop.permute.xlu2 %705  ;;  %v3020_v30 = vpop.permute.xlu1 %685 }
 0x10e   : > { %v3022_v50 = vpop.permute.xlu0 %683 }
 0x113   : > { %905 = vrot.lane.b32.xlu2 %v2446_v0, %s2393_s23  ;;  %903 = vrot.lane.b32.xlu1 %v2461_v4, %s2393_s23 }
 0x114   : > { %901 = vrot.lane.b32.xlu0 %v2449_v1, %s2393_s23 }
 0x115   : > { %v3030_v54 = vpop.permute.xlu2 %775  ;;  %v3032_v62 = vpop.permute.xlu1 %691 }
 0x116   : > { %v3034_v35 = vpop.permute.xlu0 %689 }
 0x11b   : > { %911 = vrot.lane.b32.xlu2 %v2473_v7, %s2393_s23  ;;  %909 = vrot.lane.b32.xlu1 %v2476_v8, %s2393_s23 }
 0x11c   : > { %907 = vrot.lane.b32.xlu0 %v2458_v3, %s2393_s23 }
 0x11d   : > { %v3042_v0 = vpop.permute.xlu2 %781  ;;  %v3044_v4 = vpop.permute.xlu1 %697 }
 0x11e   : > { %v3046_v1 = vpop.permute.xlu0 %695 }
 0x123   : > { %917 = vrot.lane.b32.xlu2 %v2488_v10, %s2393_s23  ;;  %915 = vrot.lane.b32.xlu1 %v2491_v11, %s2393_s23 }
 0x124   : > { %913 = vrot.lane.b32.xlu0 %v2470_v6, %s2393_s23 }
 0x125   : > { %v3054_v7 = vpop.permute.xlu2 %787  ;;  %v3056_v8 = vpop.permute.xlu1 %703 }
 0x126   : > { %v3058_v3 = vpop.permute.xlu0 %701 }
 0x12b   : > { %923 = vrot.lane.b32.xlu2 %v2503_v13, %s2393_s23  ;;  %921 = vrot.lane.b32.xlu1 %v2506_v14, %s2393_s23 }
 0x12c   : > { %919 = vrot.lane.b32.xlu0 %v2485_v9, %s2393_s23 }
 0x12d   : > { %v3066_v10 = vpop.permute.xlu2 %793  ;;  %v3068_v11 = vpop.permute.xlu1 %773 }
 0x12e   : > { %v3070_v6 = vpop.permute.xlu0 %707 }
 0x133   : > { %929 = vrot.lane.b32.xlu2 %v2518_v16, %s2393_s23  ;;  %927 = vrot.lane.b32.xlu1 %v2521_v17, %s2393_s23 }
 0x134   : > { %925 = vrot.lane.b32.xlu0 %v2500_v12, %s2393_s23 }
 0x135   : > { %v3078_v13 = vpop.permute.xlu2 %799  ;;  %v3080_v14 = vpop.permute.xlu1 %779 }
 0x136   : > { %4338 = vst [vmem:[#allocation89_spill] sm:$0xff] %v3078_v13  ;;  %v3082_v9 = vpop.permute.xlu0 %777  ;;  %v3145_v13 = vld [vmem:[%s2443_s19 + $0x189] sm:$0xff] }
 0x13b   : > { %935 = vrot.lane.b32.xlu2 %v2533_v19, %s2393_s23  ;;  %933 = vrot.lane.b32.xlu1 %v2536_v20, %s2393_s23 }
 0x13c   : > { %931 = vrot.lane.b32.xlu0 %v2515_v15, %s2393_s23 }
 0x13d   : > { %v3090_v16 = vpop.permute.xlu2 %805  ;;  %v3092_v17 = vpop.permute.xlu1 %785 }
 0x13e   : > { %4339 = vst [vmem:[#allocation90_spill] sm:$0xff] %v3090_v16  ;;  %v3094_v12 = vpop.permute.xlu0 %783  ;;  %v4370_v16 = vld [vmem:[#allocation79_spill] sm:$0xff] }
 0x13f   : > { %4340 = vst [vmem:[#allocation91_spill] sm:$0xff] %v3092_v17  ;;  %v4368_v17 = vld [vmem:[#allocation39_spill] sm:$0xff] }
 0x140   : > { %4341 = vst [vmem:[#allocation92_spill] sm:$0xff] %v3094_v12 }
 0x143   : > { %941 = vrot.lane.b32.xlu2 %v2548_v22, %s2393_s23  ;;  %939 = vrot.lane.b32.xlu1 %v2551_v23, %s2393_s23 }
 0x144   : > { %937 = vrot.lane.b32.xlu0 %v2530_v18, %s2393_s23 }
 0x145   : > { %v3102_v19 = vpop.permute.xlu2 %811  ;;  %v3104_v20 = vpop.permute.xlu1 %791 }
 0x146   : > { %4342 = vst [vmem:[#allocation93_spill] sm:$0xff] %v3104_v20  ;;  %v3106_v15 = vpop.permute.xlu0 %789 }
 0x147   : > { %4343 = vst [vmem:[#allocation94_spill] sm:$0xff] %v3106_v15  ;;  %v3286_v15 = vld [vmem:[%s2443_s19 + $0x18a] sm:$0xff] }
 0x14b   : > { %947 = vrot.lane.b32.xlu2 %v2563_v25, %s2393_s23  ;;  %945 = vrot.lane.b32.xlu1 %v2566_v26, %s2393_s23 }
 0x14c   : > { %943 = vrot.lane.b32.xlu0 %v2545_v21, %s2393_s23 }
 0x14d   : > { %v3114_v22 = vpop.permute.xlu2 %817  ;;  %v3116_v18 = vpop.permute.xlu1 %797 }
 0x14e   : > { %4344 = vst [vmem:[#allocation95_spill] sm:$0xff] %v3116_v18  ;;  %v3118_v23 = vpop.permute.xlu0 %795 }
 0x14f   : > { %4345 = vst [vmem:[#allocation96_spill] sm:$0xff] %v3118_v23 }
 0x153   : > { %953 = vrot.lane.b32.xlu2 %v2578_v28, %s2393_s23  ;;  %951 = vrot.lane.b32.xlu1 %v2581_v29, %s2393_s23 }
 0x154   : > { %949 = vrot.lane.b32.xlu0 %v2560_v24, %s2393_s23 }
 0x155   : > { %v3126_v25 = vpop.permute.xlu2 %823  ;;  %v3128_v21 = vpop.permute.xlu1 %803 }
 0x156   : > { %4346 = vst [vmem:[#allocation97_spill] sm:$0xff] %v3128_v21  ;;  %v3130_v26 = vpop.permute.xlu0 %801  ;;  %v3148_v21 = vld [vmem:[%s2443_s19 + $0x181] sm:$0xff] }
 0x157   : > { %4347 = vst [vmem:[#allocation98_spill] sm:$0xff] %v3130_v26 }
 0x15b   : > { %959 = vrot.lane.b32.xlu2 %v2591_v31, %s2393_s23  ;;  %957 = vrot.lane.b32.xlu1 %v2594_v32, %s2393_s23 }
 0x15c   : > { %955 = vrot.lane.b32.xlu0 %v2575_v27, %s2393_s23 }
 0x15d   : > { %v3138_v28 = vpop.permute.xlu2 %829  ;;  %v3140_v29 = vpop.permute.xlu1 %809 }
 0x15e   : > { %v3142_v24 = vpop.permute.xlu0 %807 }
 0x163   : > { %1029 = vrot.lane.b32.xlu2 %v2605_v34, %s2394_s24  ;;  %963 = vrot.lane.b32.xlu1 %v3145_v13, %s2393_s23 }
 0x164   : > { %961 = vrot.lane.b32.xlu0 %v3148_v21, %s2393_s23 }
 0x165   : > { %v3156_v27 = vpop.permute.xlu2 %835  ;;  %v3158_v31 = vpop.permute.xlu1 %815 }
 0x166   : > { %v3160_v32 = vpop.permute.xlu0 %813 }
 0x16b   : > { %1035 = vrot.lane.b32.xlu2 %v2619_v38, %s2394_s24  ;;  %1033 = vrot.lane.b32.xlu1 %v2622_v39, %s2394_s24 }
 0x16c   : > { %1031 = vrot.lane.b32.xlu0 %v2602_v33, %s2394_s24 }
 0x16d   : > { %v3168_v34 = vpop.permute.xlu2 %905  ;;  %v3170_v26 = vpop.permute.xlu1 %821 }
 0x16e   : > { %v3172_v23 = vpop.permute.xlu0 %819 }
 0x173   : > { %1041 = vrot.lane.b32.xlu2 %v2636_v42, %s2394_s24  ;;  %1039 = vrot.lane.b32.xlu1 %v2639_v43, %s2394_s24 }
 0x174   : > { %1037 = vrot.lane.b32.xlu0 %v2616_v37, %s2394_s24 }
 0x175   : > { %v3180_v38 = vpop.permute.xlu2 %911  ;;  %v3182_v39 = vpop.permute.xlu1 %827 }
 0x176   : > { %4348 = vst [vmem:[#allocation99_spill] sm:$0xff] %v3180_v38  ;;  %v3184_v33 = vpop.permute.xlu0 %825  ;;  %v2159_v38 = vld [vmem:[%s2443_s19 + $0x60] sm:$0xff] }
 0x17b   : > { %1047 = vrot.lane.b32.xlu2 %v2653_v46, %s2394_s24  ;;  %1045 = vrot.lane.b32.xlu1 %v2656_v47, %s2394_s24 }
 0x17c   : > { %1043 = vrot.lane.b32.xlu0 %v2633_v41, %s2394_s24 }
 0x17d   : > { %v3192_v42 = vpop.permute.xlu2 %917  ;;  %v3194_v43 = vpop.permute.xlu1 %833 }
 0x17e   : > { %4349 = vst [vmem:[#allocation100_spill] sm:$0xff] %v3192_v42  ;;  %v3196_v37 = vpop.permute.xlu0 %831 }
 0x183   : > { %1053 = vrot.lane.b32.xlu2 %v2674_v52, %s2394_s24  ;;  %1051 = vrot.lane.b32.xlu1 %v2677_v53, %s2394_s24 }
 0x184   : > { %1049 = vrot.lane.b32.xlu0 %v2650_v45, %s2394_s24 }
 0x185   : > { %v3204_v46 = vpop.permute.xlu2 %923  ;;  %v3206_v47 = vpop.permute.xlu1 %903 }
 0x186   : > { %4350 = vst [vmem:[#allocation101_spill] sm:$0xff] %v3204_v46  ;;  %v3208_v41 = vpop.permute.xlu0 %901 }
 0x187   : > { %4351 = vst [vmem:[#allocation102_spill] sm:$0xff] %v3208_v41 }
 0x18b   : > { %1059 = vrot.lane.b32.xlu2 %v2695_v58, %s2394_s24  ;;  %1057 = vrot.lane.b32.xlu1 %v2698_v59, %s2394_s24 }
 0x18c   : > { %1055 = vrot.lane.b32.xlu0 %v2671_v51, %s2394_s24 }
 0x18d   : > { %v3216_v52 = vpop.permute.xlu2 %929  ;;  %v3218_v53 = vpop.permute.xlu1 %909 }
 0x18e   : > { %4352 = vst [vmem:[#allocation103_spill] sm:$0xff] %v3216_v52  ;;  %v908_v45 = vpop.permute.xlu0 %907 }
 0x193   : > { %1065 = vrot.lane.b32.xlu2 %v2716_v2, %s2394_s24  ;;  %1063 = vrot.lane.b32.xlu1 %v2719_v5, %s2394_s24  ;;  %v4358_v5 = vld [vmem:[#allocation25_spill] sm:$0xff] }
 0x194   : > { %1061 = vrot.lane.b32.xlu0 %v2692_v57, %s2394_s24 }
 0x195   : > { %v3226_v58 = vpop.permute.xlu2 %935  ;;  %v3228_v59 = vpop.permute.xlu1 %915 }
 0x196   : > { %v3230_v46 = vpop.permute.xlu0 %913 }
 0x197   : > { %4353 = vst [vmem:[#allocation104_spill] sm:$0xff] %v3230_v46  ;;  %v4367_v46 = vld [vmem:[#allocation32_spill] sm:$0xff] }
 0x19b   : > { %1071 = vrot.lane.b32.xlu2 %v2737_v44, %s2394_s24  ;;  %1069 = vrot.lane.b32.xlu1 %v2740_v40, %s2394_s24 }
 0x19c   : > { %1067 = vrot.lane.b32.xlu0 %v2713_v63, %s2394_s24 }
 0x19d   : > { %v3238_v51 = vpop.permute.xlu2 %941  ;;  %v3240_v2 = vpop.permute.xlu1 %921 }
 0x19e   : > { %4354 = vst [vmem:[#allocation105_spill] sm:$0xff] %v3240_v2  ;;  %v3242_v57 = vpop.permute.xlu0 %919 }
 0x19f   : > { %4355 = vst [vmem:[#allocation106_spill] sm:$0xff] %v3242_v57  ;;  %v2156_v57 = vld [vmem:[%s2443_s19 + $0x38] sm:$0xff] }
 0x1a3   : > { %1077 = vrot.lane.b32.xlu2 %v2758_v61, %s2394_s24  ;;  %1075 = vrot.lane.b32.xlu1 %v2761_v36, %s2394_s24  ;;  %v4359_v61 = vld [vmem:[#allocation26_spill] sm:$0xff]  ;;  %v4360_v36 = vld [vmem:[#allocation20_spill] sm:$0xff] }
 0x1a4   : > { %1073 = vrot.lane.b32.xlu0 %v2734_v48, %s2394_s24 }
 0x1a5   : > { %v3250_v40 = vpop.permute.xlu2 %947  ;;  %v3252_v44 = vpop.permute.xlu1 %927 }
 0x1a6   : > { %4356 = vst [vmem:[#allocation107_spill] sm:$0xff] %v3252_v44  ;;  %v3254_v63 = vpop.permute.xlu0 %925  ;;  %v3269_v44 = vld [vmem:[%s2443_s19 + $0x182] sm:$0xff] }
 0x1a7   : > { %4357 = vst [vmem:[#allocation108_spill] sm:$0xff] %v3254_v63  ;;  %v4363_v63 = vld [vmem:[#allocation30_spill] sm:$0xff] }
 0x1ab   : > { %1083 = vrot.lane.b32.xlu2 %v4358_v5, %s2394_s24  ;;  %1081 = vrot.lane.b32.xlu1 %v4359_v61, %s2394_s24  ;;  %v4364_v5 = vld [vmem:[#allocation24_spill] sm:$0xff] }
 0x1ac   : > { %1079 = vrot.lane.b32.xlu0 %v4360_v36, %s2394_s24 }
 0x1ad   : > { %v3262_v52 = vpop.permute.xlu2 %953  ;;  %v3264_v48 = vpop.permute.xlu1 %933 }
 0x1ae   : > { %4361 = vst [vmem:[#allocation25_spill] sm:$0xff] %v3264_v48  ;;  %v3266_v18 = vpop.permute.xlu0 %931  ;;  %v4366_v48 = vld [vmem:[#allocation9_spill] sm:$0xff] }
 0x1af   : > { %4362 = vst [vmem:[#allocation26_spill] sm:$0xff] %v3266_v18  ;;  %v2155_v18 = vld [vmem:[%s2443_s19 + $0x30] sm:$0xff]  ;;  %v1513_v12 = vsel %vm1509_vm0, %v4367_v46, %v4366_v48 }
 0x1b3   : > { %1089 = vrot.lane.b32.xlu2 %v3269_v44, %s2394_s24  ;;  %1087 = vrot.lane.b32.xlu1 %v4363_v63, %s2394_s24 }
 0x1b4   : > { %1085 = vrot.lane.b32.xlu0 %v4364_v5, %s2394_s24 }
 0x1b5   : > { %v3277_v61 = vpop.permute.xlu2 %959  ;;  %v3279_v36 = vpop.permute.xlu1 %939 }
 0x1b6   : > { %v3281_v42 = vpop.permute.xlu0 %937 }
 0x1bb   : > { %1159 = vrot.lane.b32.xlu2 %v2156_v57, %s2395_s25  ;;  %1157 = vrot.lane.b32.xlu1 %v2155_v18, %s2395_s25  ;;  %v1546_v57 = vsel %vm1542_vm1, %v1513_v12, %v4368_v17  ;;  %v4369_v18 = vld [vmem:[#allocation40_spill] sm:$0xff]  ;;  %v4372_v17 = vld [vmem:[#allocation37_spill] sm:$0xff] }
 0x1bc   : > { %1091 = vrot.lane.b32.xlu0 %v3286_v15, %s2394_s24  ;;  %v1535_v2 = vsel %vm1509_vm0, %v4370_v16, %v4369_v18  ;;  %v1579_v46 = vsel %vm1575_vm2, %v1546_v57, %v3080_v14  ;;  %v2162_v14 = vld [vmem:[%s2443_s19 + $0x80] sm:$0xff]  ;;  %s4182_s24 = scalar_lea.vmem %s4204_s3, %s2293_s21 }
 0x1bd   : > { %v3292_v63 = vpop.permute.xlu2 %1029  ;;  %v3294_v5 = vpop.permute.xlu1 %945  ;;  %v1568_v41 = vsel %vm1542_vm1, %v1535_v2, %v3046_v1  ;;  %v1612_v12 = vsel %vm1608_vm3, %v1579_v46, %v908_v45  ;;  %v4373_v57 = vld [vmem:[#allocation46_spill] sm:$0xff] }
 0x1be   : > { %4365 = vst [vmem:[#allocation20_spill] sm:$0xff] %v3292_v63  ;;  %v3296_v20 = vpop.permute.xlu0 %943  ;;  %v4371_v63 = vld [vmem:[#allocation44_spill] sm:$0xff]  ;;  %v1601_v16 = vsel %vm1575_vm2, %v1568_v41, %v3126_v25  ;;  %v4374_v25 = vld [vmem:[#allocation50_spill] sm:$0xff]  ;;  %v4375_v41 = vld [vmem:[#allocation47_spill] sm:$0xff] }
 0x1bf   : > { %v4376_v45 = vld [vmem:[#allocation78_spill] sm:$0xff] }
 0x1c0   : > { %v1537_v46 = vsel %vm1509_vm0, %v4376_v45, %v4375_v41 }
 0x1c3   : > { %1165 = vrot.lane.b32.xlu2 %v2159_v38, %s2395_s25  ;;  %1163 = vrot.lane.b32.xlu1 %v4371_v63, %s2395_s25 }
 0x1c4   : > { %1161 = vrot.lane.b32.xlu0 %v4372_v17, %s2395_s25  ;;  %v1538_v17 = vsel %vm1509_vm0, %v2989_v56, %v4373_v57 }
 0x1c5   : > { %v1036_v38 = vpop.permute.xlu2 %1035  ;;  %v952_v48 = vpop.permute.xlu1 %951 }
 0x1c6   : > { %v3320_v18 = vsel %vm1641_vm4, %v1612_v12, %v1036_v38  ;;  %v3323_v1 = vsel %vm1608_vm3, %v1601_v16, %v952_v48  ;;  %v3325_v2 = vpop.permute.xlu0 %949  ;;  %v1571_v16 = vsel %vm1542_vm1, %v1538_v17, %v3058_v3  ;;  %v4377_v12 = vld [vmem:[#allocation43_spill] sm:$0xff]  ;;  %v1570_v38 = vsel %vm1542_vm1, %v1537_v46, %v2997_v55  ;;  %v4380_v46 = vld [vmem:[#allocation53_spill] sm:$0xff] }
 0x1c7   : > { %v1604_v56 = vsel %vm1575_vm2, %v1571_v16, %v3138_v28  ;;  %v1603_v57 = vsel %vm1575_vm2, %v1570_v38, %v3182_v39  ;;  %v2165_v17 = vld [vmem:[%s2443_s19 + $0xa8] sm:$0xff]  ;;  %v4381_v39 = vld [vmem:[#allocation84_spill] sm:$0xff] }
 0x1c8   : > { %v4379_v28 = vld [vmem:[#allocation55_spill] sm:$0xff]  ;;  %v1540_v16 = vsel %vm1509_vm0, %v4381_v39, %v4380_v46  ;;  %v4385_v46 = vld [vmem:[#allocation6_spill] sm:$0xff] }
 0x1cb   : > { %1171 = vrot.lane.b32.xlu2 %v2162_v14, %s2395_s25  ;;  %1169 = vrot.lane.b32.xlu1 %v4374_v25, %s2395_s25 }
 0x1cc   : > { %1167 = vrot.lane.b32.xlu0 %v4377_v12, %s2395_s25  ;;  %v4378_v12 = vld [vmem:[#allocation52_spill] sm:$0xff] }
 0x1cd   : > { %v3345_v48 = vpop.permute.xlu2 %1041  ;;  %v958_v14 = vpop.permute.xlu1 %957  ;;  %v1541_v55 = vsel %vm1509_vm0, %v3010_v49, %v4378_v12 }
 0x1ce   : > { %v3350_v41 = vsel %vm1608_vm3, %v1604_v56, %v958_v14  ;;  %v956_v45 = vpop.permute.xlu0 %955  ;;  %v1574_v38 = vsel %vm1542_vm1, %v1541_v55, %v3070_v6  ;;  %v4382_v56 = vld [vmem:[#allocation49_spill] sm:$0xff]  ;;  %v1573_v14 = vsel %vm1542_vm1, %v1540_v16, %v3018_v60  ;;  %v4386_v60 = vld [vmem:[#allocation31_spill] sm:$0xff] }
 0x1cf   : > { %v3353_v3 = vsel %vm1608_vm3, %v1603_v57, %v956_v45  ;;  %v1607_v49 = vsel %vm1575_vm2, %v1574_v38, %v3156_v27  ;;  %v1606_v45 = vsel %vm1575_vm2, %v1573_v14, %v3194_v43  ;;  %v1512_v39 = vsel %vm1509_vm0, %v4386_v60, %v4385_v46  ;;  %v4387_v27 = vld [vmem:[#allocation57_spill] sm:$0xff]  ;;  %v4389_v14 = vld [vmem:[#allocation54_spill] sm:$0xff]  ;;  %v4391_v60 = vld [vmem:[#allocation67_spill] sm:$0xff] }
 0x1d0   : > { %v1545_v16 = vsel %vm1542_vm1, %v1512_v39, %v4387_v27  ;;  %v4388_v43 = vld [vmem:[#allocation61_spill] sm:$0xff] }
 0x1d1   : > { %v1578_v38 = vsel %vm1575_vm2, %v1545_v16, %v3082_v9  ;;  %v4392_v9 = vld [vmem:[#allocation60_spill] sm:$0xff]  ;;  %v4395_v16 = vld [vmem:[#allocation29_spill] sm:$0xff] }
 0x1d3   : > { %1177 = vrot.lane.b32.xlu2 %v2165_v17, %s2395_s25  ;;  %1175 = vrot.lane.b32.xlu1 %v4379_v28, %s2395_s25  ;;  %v2168_v28 = vld [vmem:[%s2443_s19 + $0xc8] sm:$0xff] }
 0x1d4   : > { %1173 = vrot.lane.b32.xlu0 %v4382_v56, %s2395_s25 }
 0x1d5   : > { %v3373_v12 = vpop.permute.xlu2 %1047  ;;  %v964_v57 = vpop.permute.xlu1 %963 }
 0x1d6   : > { %4383 = vst [vmem:[#allocation30_spill] sm:$0xff] %v3373_v12  ;;  %v3378_v17 = vsel %vm1608_vm3, %v1607_v49, %v964_v57  ;;  %v962_v6 = vpop.permute.xlu0 %961  ;;  %v1611_v49 = vsel %vm1608_vm3, %v1578_v38, %v3168_v34  ;;  %v1528_v38 = vsel %vm1509_vm0, %v4392_v9, %v4395_v16  ;;  %v2186_v12 = vld [vmem:[%s2443_s19 + $0x1a0] sm:$0xff] }
 0x1d7   : > { %4384 = vst [vmem:[#allocation24_spill] sm:$0xff] %v3378_v17  ;;  %v3381_v55 = vsel %vm1608_vm3, %v1606_v45, %v962_v6 }
 0x1db   : > { %1183 = vrot.lane.b32.xlu2 %v2168_v28, %s2395_s25  ;;  %1181 = vrot.lane.b32.xlu1 %v4388_v43, %s2395_s25  ;;  %v2171_v28 = vld [vmem:[%s2443_s19 + $0xf0] sm:$0xff] }
 0x1dc   : > { %1179 = vrot.lane.b32.xlu0 %v4389_v14, %s2395_s25  ;;  %v4396_v14 = vld [vmem:[#allocation68_spill] sm:$0xff] }
 0x1dd   : > { %v3398_v57 = vpop.permute.xlu2 %1053  ;;  %v1034_v45 = vpop.permute.xlu1 %1033 }
 0x1de   : > { %4390 = vst [vmem:[#allocation9_spill] sm:$0xff] %v3398_v57  ;;  %v3401_v6 = vsel %vm1641_vm4, %v1611_v49, %v1034_v45  ;;  %v3403_v46 = vpop.permute.xlu0 %1031  ;;  %v1561_v49 = vsel %vm1542_vm1, %v1528_v38, %v4396_v14  ;;  %v4397_v45 = vld [vmem:[#allocation71_spill] sm:$0xff] }
 0x1df   : > { %v1594_v17 = vsel %vm1575_vm2, %v1561_v49, %v3140_v29  ;;  %v2202_v14 = vld [vmem:[%s2443_s19 + $0xe1] sm:$0xff] }
 0x1e0   : > { %v1627_v57 = vsel %vm1608_vm3, %v1594_v17, %v3281_v42  ;;  %v4402_v29 = vld [vmem:[#allocation35_spill] sm:$0xff]  ;;  %v4404_v17 = vld [vmem:[#allocation72_spill] sm:$0xff] }
 0x1e3   : > { %1189 = vrot.lane.b32.xlu2 %v2171_v28, %s2395_s25  ;;  %1187 = vrot.lane.b32.xlu1 %v4391_v60, %s2395_s25  ;;  %v4398_v28 = vld [vmem:[#allocation73_spill] sm:$0xff] }
 0x1e4   : > { %1185 = vrot.lane.b32.xlu0 %v4392_v9, %s2395_s25 }
 0x1e5   : > { %v3411_v34 = vpop.permute.xlu2 %1059  ;;  %v3413_v39 = vpop.permute.xlu1 %1039 }
 0x1e6   : > { %4393 = vst [vmem:[#allocation32_spill] sm:$0xff] %v3411_v34  ;;  %v3415_v27 = vpop.permute.xlu0 %1037  ;;  %v4399_v34 = vld [vmem:[#allocation66_spill] sm:$0xff] }
 0x1e7   : > { %4394 = vst [vmem:[#allocation39_spill] sm:$0xff] %v3413_v39  ;;  %v1531_v49 = vsel %vm1509_vm0, %v4399_v34, %v4402_v29  ;;  %v4403_v39 = vld [vmem:[#allocation74_spill] sm:$0xff]  ;;  %v4406_v29 = vld [vmem:[#allocation41_spill] sm:$0xff] }
 0x1e8   : > { %v1564_v42 = vsel %vm1542_vm1, %v1531_v49, %v4403_v39  ;;  %v1534_v49 = vsel %vm1509_vm0, %v4404_v17, %v4406_v29 }
 0x1eb   : > { %1195 = vrot.lane.b32.xlu2 %v4397_v45, %s2395_s25  ;;  %1193 = vrot.lane.b32.xlu1 %v4398_v28, %s2395_s25 }
 0x1ec   : > { %1191 = vrot.lane.b32.xlu0 %v4399_v34, %s2395_s25 }
 0x1ed   : > { %v1066_v56 = vpop.permute.xlu2 %1065  ;;  %v3432_v9 = vpop.permute.xlu1 %1045 }
 0x1ee   : > { %4400 = vst [vmem:[#allocation40_spill] sm:$0xff] %v3432_v9  ;;  %v3435_v16 = vsel %vm1641_vm4, %v1627_v57, %v1066_v56  ;;  %v3437_v38 = vpop.permute.xlu0 %1043  ;;  %v1597_v56 = vsel %vm1575_vm2, %v1564_v42, %v3158_v31  ;;  %v2218_v31 = vld [vmem:[%s2443_s19 + $0x1a1] sm:$0xff]  ;;  %v4407_v42 = vld [vmem:[#allocation80_spill] sm:$0xff] }
 0x1ef   : > { %4401 = vst [vmem:[#allocation79_spill] sm:$0xff] %v3435_v16  ;;  %v1630_v57 = vsel %vm1608_vm3, %v1597_v56, %v3296_v20  ;;  %v1567_v20 = vsel %vm1542_vm1, %v1534_v49, %v4407_v42  ;;  %v2185_v49 = vld [vmem:[%s2443_s19 + $0x198] sm:$0xff]  ;;  %v4409_v42 = vld [vmem:[#allocation11_spill] sm:$0xff] }
 0x1f3   : > { %1315 = vrot.lane.b32.xlu2 %v2202_v14, %s2396_s26  ;;  %1219 = vrot.lane.b32.xlu1 %v2186_v12, %s2395_s25  ;;  %v2250_v14 = vld [vmem:[%s2443_s19 + $0x1a2] sm:$0xff] }
 0x1f4   : > { %1197 = vrot.lane.b32.xlu0 %v4404_v17, %s2395_s25  ;;  %v2234_v12 = vld [vmem:[%s2443_s19 + $0xe2] sm:$0xff] }
 0x1f5   : > { %v1072_v16 = vpop.permute.xlu2 %1071  ;;  %v3454_v9 = vpop.permute.xlu1 %1051 }
 0x1f6   : > { %v3457_v34 = vsel %vm1641_vm4, %v1630_v57, %v1072_v16  ;;  %v3459_v39 = vpop.permute.xlu0 %1049  ;;  %v1600_v16 = vsel %vm1575_vm2, %v1567_v20, %v3170_v26  ;;  %v4410_v26 = vld [vmem:[#allocation59_spill] sm:$0xff]  ;;  %v4411_v20 = vld [vmem:[#allocation85_spill] sm:$0xff] }
 0x1f7   : > { %4405 = vst [vmem:[#allocation44_spill] sm:$0xff] %v3457_v34  ;;  %v1633_v56 = vsel %vm1608_vm3, %v1600_v16, %v3325_v2 }
 0x1fb   : > { %1475 = vrot.lane.b32.xlu2 %v2250_v14, %s2397_s27  ;;  %1443 = vrot.lane.b32.xlu1 %v2234_v12, %s2397_s27  ;;  %v2217_v14 = vld [vmem:[%s2443_s19 + $0x199] sm:$0xff] }
 0x1fc   : > { %1347 = vrot.lane.b32.xlu0 %v2218_v31, %s2396_s26  ;;  %v2201_v12 = vld [vmem:[%s2443_s19 + $0xd9] sm:$0xff]  ;;  %v1527_v31 = vsel %vm1509_vm0, %v4410_v26, %v4409_v42 }
 0x1fd   : > { %v1078_v57 = vpop.permute.xlu2 %1077  ;;  %v3476_v34 = vpop.permute.xlu1 %1057  ;;  %v1560_v2 = vsel %vm1542_vm1, %v1527_v31, %v4411_v20  ;;  %v2233_v31 = vld [vmem:[%s2443_s19 + $0xda] sm:$0xff] }
 0x1fe   : > { %v3479_v17 = vsel %vm1641_vm4, %v1633_v56, %v1078_v57  ;;  %v3481_v29 = vpop.permute.xlu0 %1055  ;;  %v1593_v16 = vsel %vm1575_vm2, %v1560_v2, %v3142_v24  ;;  %v4412_v24 = vld [vmem:[#allocation14_spill] sm:$0xff]  ;;  %v4413_v20 = vld [vmem:[#allocation65_spill] sm:$0xff]  ;;  %v4414_v2 = vld [vmem:[#allocation28_spill] sm:$0xff] }
 0x1ff   : > { %4408 = vst [vmem:[#allocation46_spill] sm:$0xff] %v3479_v17  ;;  %v1626_v56 = vsel %vm1608_vm3, %v1593_v16, %v3226_v58  ;;  %v1529_v58 = vsel %vm1509_vm0, %v4391_v60, %v4414_v2  ;;  %v4415_v16 = vld [vmem:[#allocation87_spill] sm:$0xff]  ;;  %v4416_v2 = vld [vmem:[#allocation10_spill] sm:$0xff] }
 0x203   : > { %1345 = vrot.lane.b32.xlu2 %v2217_v14, %s2396_s26  ;;  %1313 = vrot.lane.b32.xlu1 %v2201_v12, %s2396_s26  ;;  %v2249_v12 = vld [vmem:[%s2443_s19 + $0x19a] sm:$0xff] }
 0x204   : > { %1217 = vrot.lane.b32.xlu0 %v2185_v49, %s2395_s25  ;;  %v1530_v49 = vsel %vm1509_vm0, %v4413_v20, %v4412_v24  ;;  %v196_v20 = vld [vmem:[%s2443_s19 + $0x8] sm:$0xff] }
 0x205   : > { %v1084_v57 = vpop.permute.xlu2 %1083  ;;  %v1064_v17 = vpop.permute.xlu1 %1063 }
 0x206   : > { %v3500_v42 = vsel %vm1641_vm4, %v3353_v3, %v1084_v57  ;;  %v3503_v26 = vsel %vm1641_vm4, %v1626_v56, %v1064_v17  ;;  %v3505_v14 = vpop.permute.xlu0 %1061  ;;  %v1563_v3 = vsel %vm1542_vm1, %v1530_v49, %v3020_v30  ;;  %v1562_v17 = vsel %vm1542_vm1, %v1529_v58, %v3022_v50  ;;  %v2200_v58 = vld [vmem:[%s2443_s19 + $0xc9] sm:$0xff] }
 0x207   : > { %v1596_v56 = vsel %vm1575_vm2, %v1563_v3, %v3160_v32  ;;  %v1595_v60 = vsel %vm1575_vm2, %v1562_v17, %v3102_v19  ;;  %v2232_v19 = vld [vmem:[%s2443_s19 + $0xca] sm:$0xff]  ;;  %v4417_v3 = vld [vmem:[#allocation17_spill] sm:$0xff]  ;;  %v4419_v17 = vld [vmem:[#allocation34_spill] sm:$0xff] }
 0x208   : > { %v1629_v30 = vsel %vm1608_vm3, %v1596_v56, %v3238_v51  ;;  %v1511_v51 = vsel %vm1509_vm0, %v196_v20, %v4416_v2  ;;  %v1532_v56 = vsel %vm1509_vm0, %v4398_v28, %v4419_v17  ;;  %v4422_v2 = vld [vmem:[#allocation21_spill] sm:$0xff] }
 0x20b   : > { %1215 = vrot.lane.b32.xlu2 %v4415_v16, %s2395_s25  ;;  %1473 = vrot.lane.b32.xlu1 %v2249_v12, %s2397_s27  ;;  %v1628_v12 = vsel %vm1608_vm3, %v1595_v60, %v3279_v36  ;;  %v1533_v36 = vsel %vm1509_vm0, %v4397_v45, %v4417_v3  ;;  %v4418_v16 = vld [vmem:[#allocation58_spill] sm:$0xff]  ;;  %v1565_v45 = vsel %vm1542_vm1, %v1532_v56, %v3034_v35 }
 0x20c   : > { %1441 = vrot.lane.b32.xlu0 %v2233_v31, %s2397_s27 }
 0x20d   : > { %v1090_v57 = vpop.permute.xlu2 %1089  ;;  %v1070_v24 = vpop.permute.xlu1 %1069 }
 0x20e   : > { %v3534_v50 = vsel %vm1641_vm4, %v3381_v55, %v1090_v57  ;;  %v3537_v32 = vsel %vm1641_vm4, %v1629_v30, %v1070_v24  ;;  %v1068_v31 = vpop.permute.xlu0 %1067  ;;  %v1544_v55 = vsel %vm1542_vm1, %v1511_v51, %v4418_v16  ;;  %v1566_v30 = vsel %vm1542_vm1, %v1533_v36, %v3032_v62  ;;  %v4423_v51 = vld [vmem:[#allocation77_spill] sm:$0xff] }
 0x20f   : > { %v3540_v49 = vsel %vm1641_vm4, %v1628_v12, %v1068_v31  ;;  %v1577_v60 = vsel %vm1575_vm2, %v1544_v55, %v3030_v54  ;;  %v1599_v57 = vsel %vm1575_vm2, %v1566_v30, %v3172_v23  ;;  %v1598_v62 = vsel %vm1575_vm2, %v1565_v45, %v3114_v22  ;;  %v2199_v31 = vld [vmem:[%s2443_s19 + $0xc1] sm:$0xff]  ;;  %v4425_v55 = vld [vmem:[#allocation88_spill] sm:$0xff] }
 0x210   : > { %v1610_v28 = vsel %vm1608_vm3, %v1577_v60, %v3206_v47  ;;  %v1632_v54 = vsel %vm1608_vm3, %v1599_v57, %v3250_v40  ;;  %v1631_v35 = vsel %vm1608_vm3, %v1598_v62, %v3294_v5  ;;  %v4420_v40 = vld [vmem:[#allocation2_spill] sm:$0xff]  ;;  %v4424_v5 = vld [vmem:[#allocation64_spill] sm:$0xff]  ;;  %v4428_v62 = vld [vmem:[#allocation83_spill] sm:$0xff] }
 0x213   : > { %1439 = vrot.lane.b32.xlu2 %v2232_v19, %s2397_s27  ;;  %1343 = vrot.lane.b32.xlu1 %v3145_v13, %s2396_s26  ;;  %v1643_v13 = vsel %vm1641_vm4, %v1610_v28, %v3403_v46  ;;  %v4421_v19 = vld [vmem:[#allocation38_spill] sm:$0xff]  ;;  %v4426_v28 = vld [vmem:[#allocation12_spill] sm:$0xff] }
 0x214   : > { %1311 = vrot.lane.b32.xlu0 %v2200_v58, %s2396_s26  ;;  %v1514_v46 = vsel %vm1509_vm0, %v4421_v19, %v4420_v40  ;;  %v1536_v58 = vsel %vm1509_vm0, %v4423_v51, %v4422_v2 }
 0x215   : > { %v1160_v24 = vpop.permute.xlu2 %1159  ;;  %v1076_v20 = vpop.permute.xlu1 %1075  ;;  %v1547_v3 = vsel %vm1542_vm1, %v1514_v46, %v4424_v5  ;;  %v1569_v16 = vsel %vm1542_vm1, %v1536_v58, %v3044_v4  ;;  %v2198_v46 = vld [vmem:[%s2443_s19 + $0xb1] sm:$0xff] }
 0x216   : > { %v3577_v23 = vsel %vm1674_vm5, %v1643_v13, %v1160_v24  ;;  %v3580_v47 = vsel %vm1641_vm4, %v1632_v54, %v1076_v20  ;;  %v1074_v12 = vpop.permute.xlu0 %1073  ;;  %v1580_v36 = vsel %vm1575_vm2, %v1547_v3, %v3042_v0  ;;  %v1602_v17 = vsel %vm1575_vm2, %v1569_v16, %v3184_v33  ;;  %v4429_v13 = vld [vmem:[#allocation70_spill] sm:$0xff]  ;;  %v2182_v58 = vld [vmem:[%s2443_s19 + $0x170] sm:$0xff]  ;;  %v4432_v5 = vld [vmem:[#allocation33_spill] sm:$0xff] }
 0x217   : > { %v3583_v22 = vsel %vm1641_vm4, %v1631_v35, %v1074_v12  ;;  %v1613_v56 = vsel %vm1608_vm3, %v1580_v36, %v3218_v53  ;;  %v1635_v0 = vsel %vm1608_vm3, %v1602_v17, %v3262_v52  ;;  %v1517_v52 = vsel %vm1509_vm0, %v4371_v63, %v4426_v28  ;;  %v4433_v36 = vld [vmem:[#allocation76_spill] sm:$0xff] }
 0x218   : > { %v1646_v4 = vsel %vm1641_vm4, %v1613_v56, %v3415_v27  ;;  %v4427_v27 = vld [vmem:[#allocation27_spill] sm:$0xff]  ;;  %v1550_v24 = vsel %vm1542_vm1, %v1517_v52, %v4429_v13  ;;  %v4435_v56 = vld [vmem:[#allocation105_spill] sm:$0xff] }
 0x219   : > { %v1539_v54 = vsel %vm1509_vm0, %v4428_v62, %v4427_v27  ;;  %v1583_v20 = vsel %vm1575_vm2, %v1550_v24, %v3054_v7  ;;  %v2181_v52 = vld [vmem:[%s2443_s19 + $0x168] sm:$0xff]  ;;  %v2246_v27 = vld [vmem:[%s2443_s19 + $0x172] sm:$0xff] }
 0x21a   : > { %v1616_v35 = vsel %vm1608_vm3, %v1583_v20, %v3228_v59  ;;  %v2230_v62 = vld [vmem:[%s2443_s19 + $0xb2] sm:$0xff] }
 0x21b   : > { %1309 = vrot.lane.b32.xlu2 %v2199_v31, %s2396_s26  ;;  %1213 = vrot.lane.b32.xlu1 %v4425_v55, %s2395_s25  ;;  %v195_v31 = vld [vmem:[%s2443_s19] sm:$0xff] }
 0x21c   : > { %1471 = vrot.lane.b32.xlu0 %v3286_v15, %s2397_s27  ;;  %v2231_v15 = vld [vmem:[%s2443_s19 + $0xc2] sm:$0xff] }
 0x21d   : > { %v1166_v60 = vpop.permute.xlu2 %1165  ;;  %v1082_v30 = vpop.permute.xlu1 %1081 }
 0x21e   : > { %v3612_v45 = vsel %vm1674_vm5, %v1646_v4, %v1166_v60  ;;  %v3615_v57 = vsel %vm1641_vm4, %v1635_v0, %v1082_v30  ;;  %v1080_v33 = vpop.permute.xlu0 %1079  ;;  %v4436_v4 = vld [vmem:[#allocation20_spill] sm:$0xff] }
 0x21f   : > { %v3619_v53 = vsel %vm1641_vm4, %v3323_v1, %v1080_v33  ;;  %v1572_v1 = vsel %vm1542_vm1, %v1539_v54, %v3056_v8  ;;  %v1649_v8 = vsel %vm1641_vm4, %v1616_v35, %v3437_v38  ;;  %v4431_v38 = vld [vmem:[#allocation15_spill] sm:$0xff]  ;;  %v4437_v35 = vld [vmem:[#allocation13_spill] sm:$0xff] }
 0x220   : > { %v1605_v63 = vsel %vm1575_vm2, %v1572_v1, %v3196_v37  ;;  %v1520_v51 = vsel %vm1509_vm0, %v4374_v25, %v4431_v38  ;;  %v4434_v25 = vld [vmem:[#allocation102_spill] sm:$0xff]  ;;  %v2229_v1 = vld [vmem:[%s2443_s19 + $0xaa] sm:$0xff] }
 0x221   : > { %v1638_v7 = vsel %vm1608_vm3, %v1605_v63, %v3277_v61  ;;  %v4430_v61 = vld [vmem:[#allocation7_spill] sm:$0xff]  ;;  %v1553_v16 = vsel %vm1542_vm1, %v1520_v51, %v4433_v36  ;;  %v4447_v36 = vld [vmem:[#allocation92_spill] sm:$0xff] }
 0x222   : > { %v1510_v2 = vsel %vm1509_vm0, %v195_v31, %v4430_v61  ;;  %v2213_v63 = vld [vmem:[%s2443_s19 + $0x169] sm:$0xff] }
 0x223   : > { %1469 = vrot.lane.b32.xlu2 %v3269_v44, %s2397_s27  ;;  %1437 = vrot.lane.b32.xlu1 %v2231_v15, %s2397_s27  ;;  %v1543_v3 = vsel %vm1542_vm1, %v1510_v2, %v4432_v5  ;;  %v2197_v31 = vld [vmem:[%s2443_s19 + $0xa9] sm:$0xff] }
 0x224   : > { %1341 = vrot.lane.b32.xlu0 %v3148_v21, %s2396_s26  ;;  %v2214_v21 = vld [vmem:[%s2443_s19 + $0x171] sm:$0xff]  ;;  %v1576_v55 = vsel %vm1575_vm2, %v1543_v3, %v3068_v11  ;;  %v4444_v38 = vld [vmem:[#allocation63_spill] sm:$0xff] }
 0x225   : > { %v1172_v12 = vpop.permute.xlu2 %1171  ;;  %v1088_v44 = vpop.permute.xlu1 %1087  ;;  %v1609_v17 = vsel %vm1608_vm3, %v1576_v55, %v4434_v25  ;;  %v4446_v3 = vld [vmem:[#allocation91_spill] sm:$0xff]  ;;  %v4449_v25 = vld [vmem:[#allocation25_spill] sm:$0xff] }
 0x226   : > { %v3649_v40 = vsel %vm1674_vm5, %v1649_v8, %v1172_v12  ;;  %v3652_v37 = vsel %vm1641_vm4, %v1638_v7, %v1088_v44  ;;  %v1086_v19 = vpop.permute.xlu0 %1085  ;;  %v1642_v60 = vsel %vm1641_vm4, %v1609_v17, %v4436_v4  ;;  %v4438_v7 = vld [vmem:[#allocation37_spill] sm:$0xff]  ;;  %v4439_v12 = vld [vmem:[#allocation22_spill] sm:$0xff] }
 0x227   : > { %v3656_v59 = vsel %vm1641_vm4, %v3350_v41, %v1086_v19  ;;  %v1586_v41 = vsel %vm1575_vm2, %v1553_v16, %v3066_v10  ;;  %v1516_v8 = vsel %vm1509_vm0, %v4438_v7, %v4437_v35  ;;  %v1526_v44 = vsel %vm1509_vm0, %v4388_v43, %v4439_v12  ;;  %v4440_v19 = vld [vmem:[#allocation3_spill] sm:$0xff]  ;;  %v4455_v12 = vld [vmem:[#allocation42_spill] sm:$0xff] }
 0x228   : > { %v1619_v0 = vsel %vm1608_vm3, %v1586_v41, %v4435_v56  ;;  %v4448_v41 = vld [vmem:[#allocation104_spill] sm:$0xff]  ;;  %v4450_v56 = vld [vmem:[#allocation99_spill] sm:$0xff] }
 0x229   : > { %v1652_v10 = vsel %vm1641_vm4, %v1619_v0, %v3459_v39  ;;  %v4453_v35 = vld [vmem:[#allocation43_spill] sm:$0xff] }
 0x22a   : > { %v2245_v7 = vld [vmem:[%s2443_s19 + $0x16a] sm:$0xff] }
 0x22b   : > { %1339 = vrot.lane.b32.xlu2 %v2214_v21, %s2396_s26  ;;  %1307 = vrot.lane.b32.xlu1 %v2198_v46, %s2396_s26  ;;  %v4441_v21 = vld [vmem:[#allocation36_spill] sm:$0xff]  ;;  %v4442_v46 = vld [vmem:[#allocation45_spill] sm:$0xff] }
 0x22c   : > { %1211 = vrot.lane.b32.xlu0 %v2182_v58, %s2395_s25  ;;  %v1549_v61 = vsel %vm1542_vm1, %v1516_v8, %v4442_v46  ;;  %v4445_v58 = vld [vmem:[#allocation90_spill] sm:$0xff]  ;;  %v4454_v8 = vld [vmem:[#allocation4_spill] sm:$0xff]  ;;  %v4458_v46 = vld [vmem:[#allocation93_spill] sm:$0xff] }
 0x22d   : > { %v1178_v30 = vpop.permute.xlu2 %1177  ;;  %v1158_v11 = vpop.permute.xlu1 %1157  ;;  %v1582_v43 = vsel %vm1575_vm2, %v1549_v61, %v4446_v3  ;;  %v4462_v3 = vld [vmem:[#allocation30_spill] sm:$0xff] }
 0x22e   : > { %v3686_v33 = vsel %vm1674_vm5, %v1652_v10, %v1178_v30  ;;  %v3689_v15 = vsel %vm1674_vm5, %v1642_v60, %v1158_v11  ;;  %v3691_v28 = vpop.permute.xlu0 %1091  ;;  %v1615_v55 = vsel %vm1608_vm3, %v1582_v43, %v4448_v41  ;;  %v4451_v11 = vld [vmem:[#allocation39_spill] sm:$0xff]  ;;  %v4463_v41 = vld [vmem:[#allocation40_spill] sm:$0xff] }
 0x22f   : > { %v1648_v4 = vsel %vm1641_vm4, %v1615_v55, %v3345_v48  ;;  %v2180_v48 = vld [vmem:[%s2443_s19 + $0x158] sm:$0xff] }
 0x233   : > { %1209 = vrot.lane.b32.xlu2 %v2181_v52, %s2395_s25  ;;  %1467 = vrot.lane.b32.xlu1 %v2246_v27, %s2397_s27 }
 0x234   : > { %1435 = vrot.lane.b32.xlu0 %v2230_v62, %s2397_s27 }
 0x235   : > { %v3699_v39 = vpop.permute.xlu2 %1183  ;;  %v1164_v54 = vpop.permute.xlu1 %1163 }
 0x236   : > { %v3703_v13 = vsel %vm1674_vm5, %v3320_v18, %v1164_v54  ;;  %v1162_v24 = vpop.permute.xlu0 %1161  ;;  %v1515_v18 = vsel %vm1509_vm0, %v4441_v21, %v4440_v19  ;;  %v4457_v21 = vld [vmem:[#allocation69_spill] sm:$0xff] }
 0x237   : > { %v3707_v20 = vsel %vm1674_vm5, %v3401_v6, %v1162_v24  ;;  %v4443_v6 = vld [vmem:[#allocation86_spill] sm:$0xff]  ;;  %v1548_v51 = vsel %vm1542_vm1, %v1515_v18, %v4444_v38 }
 0x238   : > { %v1559_v2 = vsel %vm1542_vm1, %v1526_v44, %v4443_v6  ;;  %v1581_v16 = vsel %vm1575_vm2, %v1548_v51, %v4447_v36  ;;  %v1518_v44 = vsel %vm1509_vm0, %v4455_v12, %v4454_v8  ;;  %v4459_v6 = vld [vmem:[#allocation94_spill] sm:$0xff]  ;;  %v4471_v12 = vld [vmem:[#allocation96_spill] sm:$0xff] }
 0x239   : > { %v1592_v5 = vsel %vm1575_vm2, %v1559_v2, %v4445_v58  ;;  %v1614_v0 = vsel %vm1608_vm3, %v1581_v16, %v4450_v56  ;;  %v1551_v18 = vsel %vm1542_vm1, %v1518_v44, %v4457_v21  ;;  %v4460_v38 = vld [vmem:[#allocation106_spill] sm:$0xff]  ;;  %v4461_v58 = vld [vmem:[#allocation100_spill] sm:$0xff]  ;;  %v4473_v21 = vld [vmem:[#allocation101_spill] sm:$0xff] }
 0x23a   : > { %v1625_v17 = vsel %vm1608_vm3, %v1592_v5, %v4449_v25  ;;  %v1647_v52 = vsel %vm1641_vm4, %v1614_v0, %v4451_v11  ;;  %v1584_v2 = vsel %vm1575_vm2, %v1551_v18, %v4459_v6 }
 0x23b   : > { %1433 = vrot.lane.b32.xlu2 %v2229_v1, %s2397_s27  ;;  %1337 = vrot.lane.b32.xlu1 %v2213_v63, %s2396_s26  ;;  %v1658_v60 = vsel %vm1641_vm4, %v1625_v17, %v3505_v14  ;;  %v2196_v1 = vld [vmem:[%s2443_s19 + $0x99] sm:$0xff]  ;;  %v4452_v63 = vld [vmem:[#allocation16_spill] sm:$0xff]  ;;  %v1617_v5 = vsel %vm1608_vm3, %v1584_v2, %v4461_v58 }
 0x23c   : > { %1305 = vrot.lane.b32.xlu0 %v2197_v31, %s2396_s26  ;;  %v1519_v14 = vsel %vm1509_vm0, %v4453_v35, %v4452_v63  ;;  %v4456_v31 = vld [vmem:[#allocation51_spill] sm:$0xff]  ;;  %v1650_v55 = vsel %vm1641_vm4, %v1617_v5, %v4463_v41 }
 0x23d   : > { %v1190_v10 = vpop.permute.xlu2 %1189  ;;  %v1170_v30 = vpop.permute.xlu1 %1169  ;;  %v1552_v19 = vsel %vm1542_vm1, %v1519_v14, %v4456_v31  ;;  %v4469_v35 = vld [vmem:[#allocation75_spill] sm:$0xff]  ;;  %v4472_v31 = vld [vmem:[#allocation108_spill] sm:$0xff] }
 0x23e   : > { %v3749_v27 = vsel %vm1674_vm5, %v1658_v60, %v1190_v10  ;;  %v3752_v62 = vsel %vm1674_vm5, %v1648_v4, %v1170_v30  ;;  %v1168_v54 = vpop.permute.xlu0 %1167  ;;  %v1585_v61 = vsel %vm1575_vm2, %v1552_v19, %v4458_v46  ;;  %v2244_v4 = vld [vmem:[%s2443_s19 + $0x15a] sm:$0xff]  ;;  %v4464_v10 = vld [vmem:[#allocation19_spill] sm:$0xff] }
 0x23f   : > { %v3755_v24 = vsel %vm1674_vm5, %v1647_v52, %v1168_v54  ;;  %v1618_v51 = vsel %vm1608_vm3, %v1585_v61, %v4460_v38  ;;  %v2228_v60 = vld [vmem:[%s2443_s19 + $0x9a] sm:$0xff] }
 0x240   : > { %v1651_v43 = vsel %vm1641_vm4, %v1618_v51, %v4462_v3  ;;  %v4465_v30 = vld [vmem:[#allocation49_spill] sm:$0xff] }
 0x241   : > { %v1522_v11 = vsel %vm1509_vm0, %v4465_v30, %v4464_v10  ;;  %v2212_v52 = vld [vmem:[%s2443_s19 + $0x159] sm:$0xff]  ;;  %v2211_v3 = vld [vmem:[%s2443_s19 + $0x151] sm:$0xff]  ;;  %v4475_v30 = vld [vmem:[#allocation79_spill] sm:$0xff] }
 0x242   : > { %v4466_v54 = vld [vmem:[#allocation5_spill] sm:$0xff] }
 0x243   : > { %1303 = vrot.lane.b32.xlu2 %v2196_v1, %s2396_s26  ;;  %1207 = vrot.lane.b32.xlu1 %v2180_v48, %s2395_s25  ;;  %v4467_v1 = vld [vmem:[#allocation48_spill] sm:$0xff]  ;;  %v4474_v46 = vld [vmem:[#allocation9_spill] sm:$0xff] }
 0x244   : > { %1465 = vrot.lane.b32.xlu0 %v2245_v7, %s2397_s27  ;;  %v1521_v48 = vsel %vm1509_vm0, %v4467_v1, %v4466_v54  ;;  %v4470_v7 = vld [vmem:[#allocation95_spill] sm:$0xff] }
 0x245   : > { %v1196_v36 = vpop.permute.xlu2 %1195  ;;  %v1176_v16 = vpop.permute.xlu1 %1175  ;;  %v1554_v14 = vsel %vm1542_vm1, %v1521_v48, %v4469_v35  ;;  %v2226_v1 = vld [vmem:[%s2443_s19 + $0x82] sm:$0xff] }
 0x246   : > { %v3787_v25 = vsel %vm1674_vm5, %v3540_v49, %v1196_v36  ;;  %v3790_v17 = vsel %vm1674_vm5, %v1651_v43, %v1176_v16  ;;  %v1174_v56 = vpop.permute.xlu0 %1173  ;;  %v4468_v49 = vld [vmem:[#allocation56_spill] sm:$0xff]  ;;  %v1587_v44 = vsel %vm1575_vm2, %v1554_v14, %v4471_v12  ;;  %v2210_v48 = vld [vmem:[%s2443_s19 + $0x141] sm:$0xff] }
 0x247   : > { %v3793_v0 = vsel %vm1674_vm5, %v1650_v55, %v1174_v56  ;;  %v1555_v63 = vsel %vm1542_vm1, %v1522_v11, %v4468_v49  ;;  %v1620_v18 = vsel %vm1608_vm3, %v1587_v44, %v4473_v21  ;;  %v2195_v43 = vld [vmem:[%s2443_s19 + $0x91] sm:$0xff]  ;;  %v2178_v55 = vld [vmem:[%s2443_s19 + $0x140] sm:$0xff]  ;;  %v4476_v35 = vld [vmem:[#allocation23_spill] sm:$0xff] }
 0x248   : > { %v1588_v8 = vsel %vm1575_vm2, %v1555_v63, %v4470_v7  ;;  %v1653_v38 = vsel %vm1641_vm4, %v1620_v18, %v3454_v9  ;;  %v2179_v36 = vld [vmem:[%s2443_s19 + $0x150] sm:$0xff]  ;;  %v2194_v49 = vld [vmem:[%s2443_s19 + $0x81] sm:$0xff] }
 0x249   : > { %v1621_v19 = vsel %vm1608_vm3, %v1588_v8, %v4472_v31  ;;  %v2243_v56 = vld [vmem:[%s2443_s19 + $0x152] sm:$0xff]  ;;  %v4477_v8 = vld [vmem:[#allocation62_spill] sm:$0xff] }
 0x24a   : > { %v1654_v61 = vsel %vm1641_vm4, %v1621_v19, %v4474_v46  ;;  %v2363_v63 = vld [vmem:[%s2443_s19 + $0xb0] sm:$0xff]  ;;  %v4478_v31 = vld [vmem:[#allocation97_spill] sm:$0xff]  ;;  %v4479_v18 = vld [vmem:[#allocation26_spill] sm:$0xff] }
 0x24b   : > { %1463 = vrot.lane.b32.xlu2 %v2244_v4, %s2397_s27  ;;  %1431 = vrot.lane.b32.xlu1 %v2228_v60, %s2397_s27  ;;  %v2227_v4 = vld [vmem:[%s2443_s19 + $0x92] sm:$0xff]  ;;  %v1525_v14 = vsel %vm1509_vm0, %v2363_v63, %v4476_v35 }
 0x24c   : > { %1335 = vrot.lane.b32.xlu0 %v2212_v52, %s2396_s26  ;;  %v1558_v12 = vsel %vm1542_vm1, %v1525_v14, %v4477_v8  ;;  %v2364_v14 = vld [vmem:[%s2443_s19 + $0xa8] sm:$0xff] }
 0x24d   : > { %v1316_v6 = vpop.permute.xlu2 %1315  ;;  %v1182_v2 = vpop.permute.xlu1 %1181  ;;  %v1591_v19 = vsel %vm1575_vm2, %v1558_v12, %v4478_v31  ;;  %v2208_v8 = vld [vmem:[%s2443_s19 + $0x129] sm:$0xff] }
 0x24e   : > { %v3824_v51 = vsel %vm1674_vm5, %v1654_v61, %v1182_v2  ;;  %v1180_v58 = vpop.permute.xlu0 %1179  ;;  %v1624_v46 = vsel %vm1608_vm3, %v1591_v19, %v4479_v18  ;;  %v2193_v61 = vld [vmem:[%s2443_s19 + $0x79] sm:$0xff]  ;;  %v2192_v12 = vld [vmem:[%s2443_s19 + $0x69] sm:$0xff] }
 0x24f   : > { %v3827_v5 = vsel %vm1674_vm5, %v1653_v38, %v1180_v58  ;;  %v2177_v2 = vld [vmem:[%s2443_s19 + $0x138] sm:$0xff]  ;;  %v4480_v38 = vld [vmem:[#allocation32_spill] sm:$0xff]  ;;  %v2176_v19 = vld [vmem:[%s2443_s19 + $0x128] sm:$0xff] }
 0x250   : > { %v1657_v58 = vsel %vm1641_vm4, %v1624_v46, %v4480_v38  ;;  %v4484_v18 = vld [vmem:[#allocation98_spill] sm:$0xff] }
 0x253   : > { %1333 = vrot.lane.b32.xlu2 %v2211_v3, %s2396_s26  ;;  %1301 = vrot.lane.b32.xlu1 %v2195_v43, %s2396_s26  ;;  %v2242_v3 = vld [vmem:[%s2443_s19 + $0x142] sm:$0xff] }
 0x254   : > { %1205 = vrot.lane.b32.xlu0 %v2179_v36, %s2395_s25 }
 0x255   : > { %v1476_v16 = vpop.permute.xlu2 %1475  ;;  %v1188_v9 = vpop.permute.xlu1 %1187 }
 0x256   : > { %v3835_v41 = vpop.permute.xlu0 %1185  ;;  %v1690_v43 = vsel %vm1674_vm5, %v1657_v58, %v1188_v9 }
 0x257   : > { %v1723_v9 = vsel %vm1707_vm6, %v1690_v43, %v1316_v6  ;;  %v2209_v6 = vld [vmem:[%s2443_s19 + $0x139] sm:$0xff] }
 0x25b   : > { %1203 = vrot.lane.b32.xlu2 %v2178_v55, %s2395_s25  ;;  %1461 = vrot.lane.b32.xlu1 %v2243_v56, %s2397_s27 }
 0x25c   : > { %1429 = vrot.lane.b32.xlu0 %v2227_v4, %s2397_s27 }
 0x25d   : > { %v3843_v60 = vpop.permute.xlu2 %1345  ;;  %v1194_v10 = vpop.permute.xlu1 %1193 }
 0x25e   : > { %v3847_v11 = vsel %vm1674_vm5, %v4475_v30, %v1194_v10  ;;  %v1192_v52 = vpop.permute.xlu0 %1191 }
 0x25f   : > { %v3851_v54 = vsel %vm1674_vm5, %v3503_v26, %v1192_v52 }
 0x263   : > { %1427 = vrot.lane.b32.xlu2 %v2226_v1, %s2397_s27  ;;  %1331 = vrot.lane.b32.xlu1 %v2210_v48, %s2396_s26  ;;  %v2241_v1 = vld [vmem:[%s2443_s19 + $0x13a] sm:$0xff] }
 0x264   : > { %1299 = vrot.lane.b32.xlu0 %v2194_v49, %s2396_s26  ;;  %v2225_v48 = vld [vmem:[%s2443_s19 + $0x7a] sm:$0xff] }
 0x265   : > { %v3862_v7 = vpop.permute.xlu2 %1215  ;;  %v1220_v26 = vpop.permute.xlu1 %1219 }
 0x266   : > { %v1198_v44 = vpop.permute.xlu0 %1197 }
 0x267   : > { %v3870_v21 = vsel %vm1674_vm5, %v3537_v32, %v1198_v44  ;;  %v4481_v32 = vld [vmem:[#allocation24_spill] sm:$0xff]  ;;  %v4483_v44 = vld [vmem:[#allocation81_spill] sm:$0xff] }
 0x268   : > { %v1673_v36 = vsel %vm1641_vm4, %v4481_v32, %v3691_v28 }
 0x269   : > { %v1706_v4 = vsel %vm1674_vm5, %v1673_v36, %v1220_v26 }
 0x26b   : > { %1297 = vrot.lane.b32.xlu2 %v2193_v61, %s2396_s26  ;;  %1201 = vrot.lane.b32.xlu1 %v2177_v2, %s2395_s25  ;;  %v4485_v2 = vld [vmem:[#allocation103_spill] sm:$0xff] }
 0x26c   : > { %1459 = vrot.lane.b32.xlu0 %v2242_v3, %s2397_s27 }
 0x26d   : > { %v3886_v55 = vpop.permute.xlu2 %1439  ;;  %v1444_v56 = vpop.permute.xlu1 %1443 }
 0x26e   : > { %v1348_v10 = vpop.permute.xlu0 %1347  ;;  %v1756_v30 = vsel %vm1740_vm7, %v1723_v9, %v1444_v56 }
 0x26f   : > { %v1739_v52 = vsel %vm1707_vm6, %v1706_v4, %v1348_v10  ;;  %2251 = vmatpush.xpose.msk.msra.mxu0 %vm1801_vm8, %v1756_v30  ;;  %2294 = vmatpush.xpose.msk.msra.mxu2 %vm1801_vm8, %v1756_v30  ;;  %v2365_v10 = vld [vmem:[%s2443_s19 + $0x98] sm:$0xff]  ;;  %v4486_v30 = vld [vmem:[#allocation18_spill] sm:$0xff] }
 0x270   : > { %v1772_v28 = vsel %vm1740_vm7, %v1739_v52, %v1476_v16  ;;  %v4482_v16 = vld [vmem:[#allocation8_spill] sm:$0xff] }
 0x271   : > { %2271 = vmatpush.xpose.msk.msra.mxu1 %vm1801_vm8, %v1772_v28  ;;  %2310 = vmatpush.xpose.msk.msra.mxu3 %vm1801_vm8, %v1772_v28  ;;  %v1524_v26 = vsel %vm1509_vm0, %v2364_v14, %v4482_v16  ;;  %v2224_v52 = vld [vmem:[%s2443_s19 + $0x6a] sm:$0xff]  ;;  %v4487_v28 = vld [vmem:[#allocation82_spill] sm:$0xff] }
 0x272   : > { %v1557_v31 = vsel %vm1542_vm1, %v1524_v26, %v4483_v44 }
 0x273   : > { %1457 = vrot.lane.b32.xlu2 %v2241_v1, %s2397_s27  ;;  %1425 = vrot.lane.b32.xlu1 %v2225_v48, %s2397_s27  ;;  %v1590_v46 = vsel %vm1575_vm2, %v1557_v31, %v4484_v18  ;;  %v4488_v48 = vld [vmem:[#allocation89_spill] sm:$0xff]  ;;  %v2223_v18 = vld [vmem:[%s2443_s19 + $0x62] sm:$0xff] }
 0x274   : > { %1329 = vrot.lane.b32.xlu0 %v2209_v6, %s2396_s26  ;;  %v1623_v38 = vsel %vm1608_vm3, %v1590_v46, %v4485_v2 }
 0x275   : > { %v3903_v49 = vpop.permute.xlu2 %1309  ;;  %v1314_v63 = vpop.permute.xlu1 %1313  ;;  %v1656_v58 = vsel %vm1641_vm4, %v1623_v38, %v3476_v34  ;;  %v2191_v34 = vld [vmem:[%s2443_s19 + $0x61] sm:$0xff] }
 0x276   : > { %v1218_v35 = vpop.permute.xlu0 %1217  ;;  %v1689_v3 = vsel %vm1674_vm5, %v1656_v58, %v3835_v41  ;;  %v2240_v41 = vld [vmem:[%s2443_s19 + $0x12a] sm:$0xff]  ;;  %v2222_v58 = vld [vmem:[%s2443_s19 + $0x52] sm:$0xff] }
 0x277   : > { %v1705_v61 = vsel %vm1674_vm5, %v3534_v50, %v1218_v35  ;;  %v1722_v36 = vsel %vm1707_vm6, %v1689_v3, %v1314_v63  ;;  %v4489_v63 = vld [vmem:[#allocation107_spill] sm:$0xff]  ;;  %v2206_v3 = vld [vmem:[%s2443_s19 + $0x111] sm:$0xff] }
 0x278   : > { %v1738_v32 = vsel %vm1707_vm6, %v1705_v61, %v3843_v60  ;;  %v1523_v60 = vsel %vm1509_vm0, %v2365_v10, %v4486_v30 }
 0x279   : > { %v1556_v1 = vsel %vm1542_vm1, %v1523_v60, %v4487_v28  ;;  %v2188_v60 = vld [vmem:[%s2443_s19 + $0x39] sm:$0xff]  ;;  %v2221_v28 = vld [vmem:[%s2443_s19 + $0x4a] sm:$0xff] }
 0x27a   : > { %v1589_v6 = vsel %vm1575_vm2, %v1556_v1, %v4488_v48 }
 0x27b   : > { %1327 = vrot.lane.b32.xlu2 %v2208_v8, %s2396_s26  ;;  %1295 = vrot.lane.b32.xlu1 %v2192_v12, %s2396_s26  ;;  %v1622_v35 = vsel %vm1608_vm3, %v1589_v6, %v4489_v63 }
 0x27c   : > { %1199 = vrot.lane.b32.xlu0 %v2176_v19, %s2395_s25  ;;  %v1655_v14 = vsel %vm1641_vm4, %v1622_v35, %v3481_v29  ;;  %v2239_v19 = vld [vmem:[%s2443_s19 + $0x122] sm:$0xff] }
 0x27d   : > { %v1470_v50 = vpop.permute.xlu2 %1469  ;;  %v1474_v43 = vpop.permute.xlu1 %1473  ;;  %v1688_v8 = vsel %vm1674_vm5, %v1655_v14, %v3699_v39  ;;  %v2207_v29 = vld [vmem:[%s2443_s19 + $0x121] sm:$0xff]  ;;  %v1704_v39 = vsel %vm1674_vm5, %v3652_v37, %v3862_v7  ;;  %v1720_v37 = vsel %vm1707_vm6, %v3824_v51, %v3903_v49  ;;  %v2205_v51 = vld [vmem:[%s2443_s19 + $0x109] sm:$0xff] }
 0x27e   : > { %v1442_v56 = vpop.permute.xlu0 %1441  ;;  %v1771_v9 = vsel %vm1740_vm7, %v1738_v32, %v1474_v43  ;;  %v2190_v43 = vld [vmem:[%s2443_s19 + $0x51] sm:$0xff]  ;;  %v2189_v49 = vld [vmem:[%s2443_s19 + $0x49] sm:$0xff] }
 0x27f   : > { %v1755_v4 = vsel %vm1740_vm7, %v1722_v36, %v1442_v56  ;;  %2272 = vmatpush.xpose.msk.msra.mxu1 %vm1801_vm8, %v1771_v9  ;;  %2311 = vmatpush.xpose.msk.msra.mxu3 %vm1801_vm8, %v1771_v9 }
 0x280   : > { %2252 = vmatpush.xpose.msk.msra.mxu0 %vm1801_vm8, %v1755_v4  ;;  %2295 = vmatpush.xpose.msk.msra.mxu2 %vm1801_vm8, %v1755_v4 }
 0x283   : > { %1293 = vrot.lane.b32.xlu2 %v2191_v34, %s2396_s26  ;;  %1455 = vrot.lane.b32.xlu1 %v2240_v41, %s2397_s27 }
 0x284   : > { %1423 = vrot.lane.b32.xlu0 %v2224_v52, %s2397_s27  ;;  %v2237_v52 = vld [vmem:[%s2443_s19 + $0x10a] sm:$0xff] }
 0x285   : > { %v1340_v16 = vpop.permute.xlu2 %1339  ;;  %v1344_v26 = vpop.permute.xlu1 %1343 }
 0x286   : > { %v1312_v12 = vpop.permute.xlu0 %1311  ;;  %v1737_v61 = vsel %vm1707_vm6, %v1704_v39, %v1344_v26  ;;  %v2236_v26 = vld [vmem:[%s2443_s19 + $0xfa] sm:$0xff]  ;;  %v2187_v39 = vld [vmem:[%s2443_s19 + $0x31] sm:$0xff] }
 0x287   : > { %v1721_v44 = vsel %vm1707_vm6, %v1688_v8, %v1312_v12  ;;  %v2204_v8 = vld [vmem:[%s2443_s19 + $0xf9] sm:$0xff] }
 0x288   : > { %v1754_v31 = vsel %vm1740_vm7, %v1721_v44, %v3886_v55 }
 0x289   : > { %2253 = vmatpush.xpose.msk.msra.mxu0 %vm1801_vm8, %v1754_v31  ;;  %2296 = vmatpush.xpose.msk.msra.mxu2 %vm1801_vm8, %v1754_v31 }
 0x28b   : > { %1453 = vrot.lane.b32.xlu2 %v2239_v19, %s2397_s27  ;;  %1421 = vrot.lane.b32.xlu1 %v2223_v18, %s2397_s27  ;;  %v2203_v18 = vld [vmem:[%s2443_s19 + $0xf1] sm:$0xff] }
 0x28c   : > { %1325 = vrot.lane.b32.xlu0 %v2207_v29, %s2396_s26  ;;  %v2219_v29 = vld [vmem:[%s2443_s19 + $0x32] sm:$0xff] }
 0x28d   : > { %v3968_v55 = vpop.permute.xlu2 %1209  ;;  %v1214_v46 = vpop.permute.xlu1 %1213 }
 0x28e   : > { %v1472_v2 = vpop.permute.xlu0 %1471  ;;  %v1703_v36 = vsel %vm1674_vm5, %v3656_v59, %v1214_v46  ;;  %v2238_v59 = vld [vmem:[%s2443_s19 + $0x112] sm:$0xff] }
 0x28f   : > { %v1770_v38 = vsel %vm1740_vm7, %v1737_v61, %v1472_v2 }
 0x290   : > { %2273 = vmatpush.xpose.msk.msra.mxu1 %vm1801_vm8, %v1770_v38  ;;  %2312 = vmatpush.xpose.msk.msra.mxu3 %vm1801_vm8, %v1770_v38 }
 0x293   : > { %1419 = vrot.lane.b32.xlu2 %v2222_v58, %s2397_s27  ;;  %1323 = vrot.lane.b32.xlu1 %v2206_v3, %s2396_s26  ;;  %v2235_v3 = vld [vmem:[%s2443_s19 + $0xf2] sm:$0xff] }
 0x294   : > { %1291 = vrot.lane.b32.xlu0 %v2190_v43, %s2396_s26 }
 0x295   : > { %v1434_v7 = vpop.permute.xlu2 %1433  ;;  %v1438_v32 = vpop.permute.xlu1 %1437 }
 0x296   : > { %v1342_v56 = vpop.permute.xlu0 %1341  ;;  %v1753_v9 = vsel %vm1740_vm7, %v1720_v37, %v1438_v32 }
 0x297   : > { %v1736_v4 = vsel %vm1707_vm6, %v1703_v36, %v1342_v56  ;;  %2254 = vmatpush.xpose.msk.msra.mxu0 %vm1801_vm8, %v1753_v9  ;;  %2297 = vmatpush.xpose.msk.msra.mxu2 %vm1801_vm8, %v1753_v9 }
 0x298   : > { %v1769_v34 = vsel %vm1740_vm7, %v1736_v4, %v1470_v50  ;;  %v4490_v4 = vld [vmem:[#allocation46_spill] sm:$0xff] }
 0x299   : > { %2274 = vmatpush.xpose.msk.msra.mxu1 %vm1801_vm8, %v1769_v34  ;;  %2313 = vmatpush.xpose.msk.msra.mxu3 %vm1801_vm8, %v1769_v34 }
 0x29b   : > { %1321 = vrot.lane.b32.xlu2 %v2205_v51, %s2396_s26  ;;  %1289 = vrot.lane.b32.xlu1 %v2189_v49, %s2396_s26 }
 0x29c   : > { %1451 = vrot.lane.b32.xlu0 %v2238_v59, %s2397_s27 }
 0x29d   : > { %v1304_v41 = vpop.permute.xlu2 %1303  ;;  %v1308_v10 = vpop.permute.xlu1 %1307 }
 0x29e   : > { %v1212_v30 = vpop.permute.xlu0 %1211  ;;  %v1719_v63 = vsel %vm1707_vm6, %v3827_v5, %v1308_v10  ;;  %v1717_v43 = vsel %vm1707_vm6, %v3790_v17, %v1304_v41 }
 0x29f   : > { %v1702_v50 = vsel %vm1674_vm5, %v3500_v42, %v1212_v30 }
 0x2a0   : > { %v1735_v6 = vsel %vm1707_vm6, %v1702_v50, %v1340_v16  ;;  %v2220_v16 = vld [vmem:[%s2443_s19 + $0x3a] sm:$0xff] }
 0x2a3   : > { %1287 = vrot.lane.b32.xlu2 %v2188_v60, %s2396_s26  ;;  %1449 = vrot.lane.b32.xlu1 %v2237_v52, %s2397_s27 }
 0x2a4   : > { %1417 = vrot.lane.b32.xlu0 %v2221_v28, %s2397_s27 }
 0x2a5   : > { %v1464_v1 = vpop.permute.xlu2 %1463  ;;  %v1468_v48 = vpop.permute.xlu1 %1467 }
 0x2a6   : > { %v1436_v35 = vpop.permute.xlu0 %1435  ;;  %v1768_v14 = vsel %vm1740_vm7, %v1735_v6, %v1468_v48 }
 0x2a7   : > { %v1752_v42 = vsel %vm1740_vm7, %v1719_v63, %v1436_v35  ;;  %2275 = vmatpush.xpose.msk.msra.mxu1 %vm1801_vm8, %v1768_v14  ;;  %2314 = vmatpush.xpose.msk.msra.mxu3 %vm1801_vm8, %v1768_v14 }
 0x2a8   : > { %2255 = vmatpush.xpose.msk.msra.mxu0 %vm1801_vm8, %v1752_v42  ;;  %2298 = vmatpush.xpose.msk.msra.mxu2 %vm1801_vm8, %v1752_v42 }
 0x2ab   : > { %1415 = vrot.lane.b32.xlu1 %v2220_v16, %s2397_s27  ;;  %1447 = vrot.lane.b32.xlu2 %v2236_v26, %s2397_s27 }
 0x2ac   : > { %1319 = vrot.lane.b32.xlu0 %v2204_v8, %s2396_s26 }
 0x2ad   : > { %v1338_v5 = vpop.permute.xlu1 %1337  ;;  %v1334_v44 = vpop.permute.xlu2 %1333 }
 0x2ae   : > { %v1306_v12 = vpop.permute.xlu0 %1305 }
 0x2af   : > { %v1718_v31 = vsel %vm1707_vm6, %v3686_v33, %v1306_v12  ;;  %v1701_v33 = vsel %vm1674_vm5, %v3615_v57, %v3968_v55 }
 0x2b0   : > { %v1751_v19 = vsel %vm1740_vm7, %v1718_v31, %v1434_v7  ;;  %v1734_v61 = vsel %vm1707_vm6, %v1701_v33, %v1338_v5  ;;  %v4491_v31 = vld [vmem:[#allocation44_spill] sm:$0xff] }
 0x2b1   : > { %2256 = vmatpush.xpose.msk.msra.mxu0 %vm1801_vm8, %v1751_v19  ;;  %2299 = vmatpush.xpose.msk.msra.mxu2 %vm1801_vm8, %v1751_v19 }
 0x2b3   : > { %1317 = vrot.lane.b32.xlu1 %v2203_v18, %s2396_s26  ;;  %1413 = vrot.lane.b32.xlu2 %v2219_v29, %s2397_s27 }
 0x2b4   : > { %1285 = vrot.lane.b32.xlu0 %v2187_v39, %s2396_s26 }
 0x2b5   : > { %v1208_v46 = vpop.permute.xlu1 %1207  ;;  %v1204_v58 = vpop.permute.xlu2 %1203 }
 0x2b6   : > { %v1466_v2 = vpop.permute.xlu0 %1465  ;;  %v1700_v57 = vsel %vm1674_vm5, %v3619_v53, %v1208_v46 }
 0x2b7   : > { %v1767_v38 = vsel %vm1740_vm7, %v1734_v61, %v1466_v2 }
 0x2b8   : > { %2276 = vmatpush.xpose.msk.msra.mxu1 %vm1801_vm8, %v1767_v38  ;;  %2315 = vmatpush.xpose.msk.msra.mxu3 %vm1801_vm8, %v1767_v38 }
 0x2bc   : > { %1445 = vrot.lane.b32.xlu0 %v2235_v3, %s2397_s27 }
 0x2bd   : > { %v1432_v37 = vpop.permute.xlu1 %1431  ;;  %v1428_v17 = vpop.permute.xlu2 %1427 }
 0x2be   : > { %v1336_v55 = vpop.permute.xlu0 %1335  ;;  %v1750_v7 = vsel %vm1740_vm7, %v1717_v43, %v1432_v37 }
 0x2bf   : > { %v1733_v32 = vsel %vm1707_vm6, %v1700_v57, %v1336_v55  ;;  %2257 = vmatpush.xpose.msk.msra.mxu0 %vm1801_vm8, %v1750_v7  ;;  %2300 = vmatpush.xpose.msk.msra.mxu2 %vm1801_vm8, %v1750_v7 }
 0x2c0   : > { %v1766_v36 = vsel %vm1740_vm7, %v1733_v32, %v1464_v1  ;;  %v1698_v1 = vsel %vm1674_vm5, %v3580_v47, %v1204_v58 }
 0x2c1   : > { %2277 = vmatpush.xpose.msk.msra.mxu1 %vm1801_vm8, %v1766_v36  ;;  %2316 = vmatpush.xpose.msk.msra.mxu3 %vm1801_vm8, %v1766_v36 }
 0x2c5   : > { %v1302_v56 = vpop.permute.xlu1 %1301  ;;  %v1298_v34 = vpop.permute.xlu2 %1297 }
 0x2c6   : > { %v1206_v9 = vpop.permute.xlu0 %1205  ;;  %v1716_v59 = vsel %vm1707_vm6, %v3793_v0, %v1302_v56  ;;  %v1714_v14 = vsel %vm1707_vm6, %v3752_v62, %v1298_v34 }
 0x2c7   : > { %v1699_v53 = vsel %vm1674_vm5, %v4490_v4, %v1206_v9 }
 0x2c8   : > { %v1732_v49 = vsel %vm1707_vm6, %v1699_v53, %v1334_v44  ;;  %v2398_v53 = vmov 0  }
 0x2c9   : > { %2360 = vset.pattern.permute.xlu1 %v2398_v53  ;;  %2362 = vset.pattern.permute.xlu0 %v2398_v53 }
 0x2ca   : > { %2361 = vset.pattern.permute.xlu2 %v2398_v53 }
 0x2cd   : > { %v1462_v51 = vpop.permute.xlu1 %1461  ;;  %v1458_v28 = vpop.permute.xlu2 %1457 }
 0x2ce   : > { %v1430_v41 = vpop.permute.xlu0 %1429  ;;  %v1765_v10 = vsel %vm1740_vm7, %v1732_v49, %v1462_v51 }
 0x2cf   : > { %v1749_v30 = vsel %vm1740_vm7, %v1716_v59, %v1430_v41  ;;  %2278 = vmatpush.xpose.msk.msra.mxu1 %vm1801_vm8, %v1765_v10  ;;  %2317 = vmatpush.xpose.msk.msra.mxu3 %vm1801_vm8, %v1765_v10  ;;  %v1777_v59 = vld [vmem:[%s4203_s2] sm:$0xff]  ;;  %v1778_v41 = vld [vmem:[%s4203_s2 + $0x8] sm:$0xff] }
 0x2d0   : > { %2258 = vmatpush.xpose.msk.msra.mxu0 %vm1801_vm8, %v1749_v30  ;;  %2301 = vmatpush.xpose.msk.msra.mxu2 %vm1801_vm8, %v1749_v30 }
 0x2d1   : > { %1783 = vperm.xlu1 %2360, %v1777_v59   ;;  %1788 = vperm.xlu2 %2361, %v1778_v41  }
 0x2d5   : > { %v1332_v60 = vpop.permute.xlu1 %1331 }
 0x2d6   : > { %v1300_v52 = vpop.permute.xlu0 %1299  ;;  %v1731_v6 = vsel %vm1707_vm6, %v1698_v1, %v1332_v60 }
 0x2d7   : > { %v1715_v50 = vsel %vm1707_vm6, %v3649_v40, %v1300_v52  ;;  %v1328_v40 = vpop.permute.xlu2 %1327 }
 0x2d8   : > { %v1748_v0 = vsel %vm1740_vm7, %v1715_v50, %v1428_v17 }
 0x2d9   : > { %2259 = vmatpush.xpose.msk.msra.mxu0 %vm1801_vm8, %v1748_v0  ;;  %2302 = vmatpush.xpose.msk.msra.mxu2 %vm1801_vm8, %v1748_v0 }
 0x2dd   : > { %v1202_v48 = vpop.permute.xlu1 %1201 }
 0x2de   : > { %v1460_v63 = vpop.permute.xlu0 %1459  ;;  %v1697_v16 = vsel %vm1674_vm5, %v3583_v22, %v1202_v48 }
 0x2df   : > { %v1764_v35 = vsel %vm1740_vm7, %v1731_v6, %v1460_v63  ;;  %v1294_v62 = vpop.permute.xlu2 %1293  ;;  %v1775_v6 = vld [vmem:[%s4202_s1 + $0x10] sm:$0xff]  ;;  %v1773_v63 = vld [vmem:[%s4202_s1] sm:$0xff] }
 0x2e0   : > { %2279 = vmatpush.xpose.msk.msra.mxu1 %vm1801_vm8, %v1764_v35  ;;  %2318 = vmatpush.xpose.msk.msra.mxu3 %vm1801_vm8, %v1764_v35  ;;  %v1712_v2 = vsel %vm1707_vm6, %v3612_v45, %v1294_v62 }
 0x2e5   : > { %v1426_v42 = vpop.permute.xlu1 %1425 }
 0x2e6   : > { %v1330_v26 = vpop.permute.xlu0 %1329  ;;  %v1747_v47 = vsel %vm1740_vm7, %v1714_v14, %v1426_v42  ;;  %v1776_v42 = vld [vmem:[%s4202_s1 + $0x18] sm:$0xff] }
 0x2e7   : > { %v1730_v8 = vsel %vm1707_vm6, %v1697_v16, %v1330_v26  ;;  %2260 = vmatpush.xpose.msk.msra.mxu0 %vm1801_vm8, %v1747_v47  ;;  %2303 = vmatpush.xpose.msk.msra.mxu2 %vm1801_vm8, %v1747_v47  ;;  %v1454_v19 = vpop.permute.xlu2 %1453  ;;  %v1774_v16 = vld [vmem:[%s4202_s1 + $0x8] sm:$0xff] }
 0x2e8   : > { %v1763_v5 = vsel %vm1740_vm7, %v1730_v8, %v1458_v28 }
 0x2e9   : > { %2280 = vmatpush.xpose.msk.msra.mxu1 %vm1801_vm8, %v1763_v5  ;;  %2319 = vmatpush.xpose.msk.msra.mxu3 %vm1801_vm8, %v1763_v5 }
 0x2ed   : > { %v1296_v12 = vpop.permute.xlu1 %1295 }
 0x2ee   : > { %v1200_v44 = vpop.permute.xlu0 %1199  ;;  %v1713_v39 = vsel %vm1707_vm6, %v3755_v24, %v1296_v12 }
 0x2ef   : > { %v1696_v22 = vsel %vm1674_vm5, %v4491_v31, %v1200_v44  ;;  %v1420_v3 = vpop.permute.xlu2 %1419 }
 0x2f0   : > { %v1729_v29 = vsel %vm1707_vm6, %v1696_v22, %v1328_v40 }
 0x2f5   : > { %v1456_v18 = vpop.permute.xlu1 %1455 }
 0x2f6   : > { %v1424_v33 = vpop.permute.xlu0 %1423  ;;  %v1762_v46 = vsel %vm1740_vm7, %v1729_v29, %v1456_v18 }
 0x2f7   : > { %v1746_v61 = vsel %vm1740_vm7, %v1713_v39, %v1424_v33  ;;  %2281 = vmatpush.xpose.msk.msra.mxu1 %vm1801_vm8, %v1762_v46  ;;  %2320 = vmatpush.xpose.msk.msra.mxu3 %vm1801_vm8, %v1762_v46  ;;  %v1322_v32 = vpop.permute.xlu2 %1321 }
 0x2f8   : > { %2261 = vmatpush.xpose.msk.msra.mxu0 %vm1801_vm8, %v1746_v61  ;;  %2304 = vmatpush.xpose.msk.msra.mxu2 %vm1801_vm8, %v1746_v61 }
 0x2fd   : > { %v1422_v38 = vpop.permute.xlu1 %1421 }
 0x2fe   : > { %v1326_v58 = vpop.permute.xlu0 %1325  ;;  %v1745_v24 = vsel %vm1740_vm7, %v1712_v2, %v1422_v38 }
 0x2ff   : > { %v1728_v43 = vsel %vm1707_vm6, %v3870_v21, %v1326_v58  ;;  %2262 = vmatpush.xpose.msk.msra.mxu0 %vm1801_vm8, %v1745_v24  ;;  %2305 = vmatpush.xpose.msk.msra.mxu2 %vm1801_vm8, %v1745_v24  ;;  %v1288_v9 = vpop.permute.xlu2 %1287 }
 0x300   : > { %v1761_v37 = vsel %vm1740_vm7, %v1728_v43, %v1454_v19  ;;  %v1709_v10 = vsel %vm1707_vm6, %v3577_v23, %v1288_v9  ;;  %v1780_v23 = vld [vmem:[%s4203_s2 + $0x18] sm:$0xff] }
 0x301   : > { %2282 = vmatpush.xpose.msk.msra.mxu1 %vm1801_vm8, %v1761_v37  ;;  %2321 = vmatpush.xpose.msk.msra.mxu3 %vm1801_vm8, %v1761_v37 }
 0x302   : > { %1798 = vperm.xlu1 %2360, %v1780_v23  }
 0x305   : > { %v1324_v57 = vpop.permute.xlu1 %1323 }
 0x306   : > { %v1292_v45 = vpop.permute.xlu0 %1291  ;;  %v1727_v36 = vsel %vm1707_vm6, %v3787_v25, %v1324_v57 }
 0x307   : > { %v1711_v55 = vsel %vm1707_vm6, %v3703_v13, %v1292_v45  ;;  %v1726_v13 = vsel %vm1707_vm6, %v3847_v11, %v1322_v32  ;;  %v1448_v11 = vpop.permute.xlu2 %1447 }
 0x308   : > { %v1744_v7 = vsel %vm1740_vm7, %v1711_v55, %v1420_v3 }
 0x309   : > { %2263 = vmatpush.xpose.msk.msra.mxu0 %vm1801_vm8, %v1744_v7  ;;  %2306 = vmatpush.xpose.msk.msra.mxu2 %vm1801_vm8, %v1744_v7 }
 0x30d   : > { %v1290_v21 = vpop.permute.xlu1 %1289 }
 0x30e   : > { %v1452_v17 = vpop.permute.xlu0 %1451  ;;  %v1710_v34 = vsel %vm1707_vm6, %v3707_v20, %v1290_v21  ;;  %v1779_v20 = vld [vmem:[%s4203_s2 + $0x10] sm:$0xff] }
 0x30f   : > { %v1760_v56 = vsel %vm1740_vm7, %v1727_v36, %v1452_v17  ;;  %1793 = vperm.xlu0 %2362, %v1779_v20   ;;  %v1414_v0 = vpop.permute.xlu2 %1413 }
 0x310   : > { %2283 = vmatpush.xpose.msk.msra.mxu1 %vm1801_vm8, %v1760_v56  ;;  %2322 = vmatpush.xpose.msk.msra.mxu3 %vm1801_vm8, %v1760_v56 }
 0x315   : > { %v1450_v4 = vpop.permute.xlu1 %1449 }
 0x316   : > { %v1418_v51 = vpop.permute.xlu0 %1417  ;;  %v1759_v25 = vsel %vm1740_vm7, %v1726_v13, %v1450_v4 }
 0x317   : > { %v1743_v49 = vsel %vm1740_vm7, %v1710_v34, %v1418_v51  ;;  %2284 = vmatpush.xpose.msk.msra.mxu1 %vm1801_vm8, %v1759_v25  ;;  %2323 = vmatpush.xpose.msk.msra.mxu3 %vm1801_vm8, %v1759_v25 }
 0x318   : > { %2264 = vmatpush.xpose.msk.msra.mxu0 %vm1801_vm8, %v1743_v49  ;;  %2307 = vmatpush.xpose.msk.msra.mxu2 %vm1801_vm8, %v1743_v49 }
 0x31d   : > { %v1416_v30 = vpop.permute.xlu1 %1415 }
 0x31e   : > { %v1320_v60 = vpop.permute.xlu0 %1319  ;;  %v1742_v52 = vsel %vm1740_vm7, %v1709_v10, %v1416_v30 }
 0x31f   : > { %v1725_v28 = vsel %vm1707_vm6, %v3851_v54, %v1320_v60  ;;  %2265 = vmatpush.xpose.msk.msra.mxu0 %vm1801_vm8, %v1742_v52  ;;  %2308 = vmatpush.xpose.msk.msra.mxu2 %vm1801_vm8, %v1742_v52 }
 0x320   : > { %v1758_v50 = vsel %vm1740_vm7, %v1725_v28, %v1448_v11 }
 0x321   : > { %2285 = vmatpush.xpose.msk.msra.mxu1 %vm1801_vm8, %v1758_v50  ;;  %2324 = vmatpush.xpose.msk.msra.mxu3 %vm1801_vm8, %v1758_v50 }
 0x325   : > { %v1318_v35 = vpop.permute.xlu1 %1317 }
 0x326   : > { %v1286_v1 = vpop.permute.xlu0 %1285 }
 0x327   : > { %v1708_v54 = vsel %vm1707_vm6, %v3689_v15, %v1286_v1  ;;  %v1724_v15 = vsel %vm1707_vm6, %v3749_v27, %v1318_v35 }
 0x328   : > { %v1741_v48 = vsel %vm1740_vm7, %v1708_v54, %v1414_v0 }
 0x329   : > { %2266 = vmatpush.xpose.msk.msra.mxu0 %vm1801_vm8, %v1741_v48  ;;  %2309 = vmatpush.xpose.msk.msra.mxu2 %vm1801_vm8, %v1741_v48 }
 0x32b   : > { %v1789_v12 = vpop.permute.xlu2 %1788 }
 0x32c   : > { %2269 = vmatmul.msk.f32.vlgmr.msra.gmra.mxu2 %vm1801_vm8, %v1775_v6  ;;  %2267 = vmatmul.msk.f32.vlgmr.msra.gmra.mxu0 %vm1801_vm8, %v1773_v63 }
 0x32e   : > { %v1446_v40 = vpop.permute.xlu0 %1445 }
 0x32f   : > { %v1757_v14 = vsel %vm1740_vm7, %v1724_v15, %v1446_v40 }
 0x330   : > { %2286 = vmatpush.xpose.msk.msra.mxu1 %vm1801_vm8, %v1757_v14  ;;  %2325 = vmatpush.xpose.msk.msra.mxu3 %vm1801_vm8, %v1757_v14 }
 0x333   : > { %2289 = vmatmul.msk.f32.vlgmr.msra.gmra.mxu3 %vm1801_vm8, %v1775_v6  ;;  %2287 = vmatmul.msk.f32.vlgmr.msra.gmra.mxu1 %vm1801_vm8, %v1773_v63 }
 0x334   : > { %2270 = vmatmul.msk.f32.gmra.mxu2 %vm1801_vm8, %v1776_v42  ;;  %2268 = vmatmul.msk.f32.gmra.mxu0 %vm1801_vm8, %v1774_v16 }
 0x33b   : > { %2290 = vmatmul.msk.f32.gmra.mxu3 %vm1801_vm8, %v1776_v42  ;;  %2288 = vmatmul.msk.f32.gmra.mxu1 %vm1801_vm8, %v1774_v16 }
 0x343   : > { %v1784_v27 = vpop.permute.xlu1 %1783 }
 0x374   : > { %v1799_v46 = vpop.permute.xlu1 %1798 }
 0x381   : > { %v1794_v5 = vpop.permute.xlu0 %1793 }
 0x3a9   : > { %v1927_v26 = vpop.f32.mrf.mxu0 }
 0x3aa   : > { %v1928_v47 = vadd.f32 %v1927_v26, %v1784_v27 }
 0x3ac   : > { %v1968_v8 = vmax.f32 %v1928_v47, 0.0 }
 0x3ae   : > { %1976 = vst [vmem:[%s4182_s24] sm:$0xff] %v1968_v8 }
 0x3af   : > { %v1933_v62 = vpop.f32.mrf.mxu2 }
 0x3b0   : > { %v1934_v44 = vadd.f32 %v1933_v62, %v1794_v5  ;;  %v1956_v31 = vpop.f32.mrf.mxu1 }
 0x3b1   : > { %v1957_v22 = vadd.f32 %v1956_v31, %v1784_v27  ;;  %v1930_v19 = vpop.f32.mrf.mxu0 }
 0x3b2   : > { %v1972_v18 = vmax.f32 %v1934_v44, 0.0  ;;  %v1931_v29 = vadd.f32 %v1930_v19, %v1789_v12 }
 0x3b3   : > { %v1969_v39 = vmax.f32 %v1957_v22, 0.0 }
 0x3b4   : > { %1980 = vst [vmem:[%s4182_s24 + $0x20] sm:$0xff] %v1972_v18  ;;  %v1970_v33 = vmax.f32 %v1931_v29, 0.0 }
 0x3b5   : > { %1977 = vst [vmem:[%s4182_s24 + $0x8] sm:$0xff] %v1969_v39 }
 0x3b6   : > { %v1962_v61 = vpop.f32.mrf.mxu3  ;;  %1978 = vst [vmem:[%s4182_s24 + $0x10] sm:$0xff] %v1970_v33 }
 0x3b7   : > { %v1963_v2 = vadd.f32 %v1962_v61, %v1794_v5  ;;  %v1936_v38 = vpop.f32.mrf.mxu2 }
 0x3b8   : > { %v1937_v58 = vadd.f32 %v1936_v38, %v1799_v46  ;;  %v1959_v24 = vpop.f32.mrf.mxu1 }
 0x3b9   : > { %v1973_v3 = vmax.f32 %v1963_v2, 0.0  ;;  %v1960_v43 = vadd.f32 %v1959_v24, %v1789_v12 }
 0x3ba   : > { %v1974_v37 = vmax.f32 %v1937_v58, 0.0 }
 0x3bb   : > { %1981 = vst [vmem:[%s4182_s24 + $0x28] sm:$0xff] %v1973_v3  ;;  %v1971_v57 = vmax.f32 %v1960_v43, 0.0 }
 0x3bc   : > { %1982 = vst [vmem:[%s4182_s24 + $0x30] sm:$0xff] %v1974_v37 }
 0x3bd   : > { %1979 = vst [vmem:[%s4182_s24 + $0x18] sm:$0xff] %v1971_v57 }
 0x3be   : > { %v1965_v45 = vpop.f32.mrf.mxu3 }
 0x3bf   : > { %v1966_v55 = vadd.f32 %v1965_v45, %v1799_v46 }
 0x3c1   : > { %v1975_v7 = vmax.f32 %v1966_v55, 0.0 }
 0x3c3   : > { %1983 = vst [vmem:[%s4182_s24 + $0x38] sm:$0xff] %v1975_v7 }
 0x3c4 PF: > { %s13_s14 = sadd.s32 1, %s2388_s14   ;;  %s4492_s12 = smov %s2384_s13 }
 0x3c5   : > { %p10_p5 = scmp.ge.s32.totalorder %s13_s14, 4   ;;  %s4493_s13 = smov %s4495_s15 }
 0x3c7   :  { %12 = sbr.rel (!%p10_p5) target bundleno = 2 (0x2), region = 64 }

</bundles_post_ra>
